<compile_context>
chip_gen: v7x
topology: tpu7x:2x2x1
jax: 0.10.0
libtpu: 0.0.40
codegen_flags: <defaults>
</compile_context>

<pallas_src>
from collections import namedtuple

import jax
import jax.numpy as jnp
from jax.experimental import pallas as pl
from jax.experimental.pallas import tpu as pltpu

# ----- small, deterministic config (mirrors MambaConfig defaults) -----------
VOCAB = 128
D_MODEL = 32                     # hidden_size
N_LAYERS = 2                     # num_mamba_layers
D_INNER = 2 * D_MODEL            # expand = 2
D_STATE = 16                     # state_size
D_CONV = 4                       # conv_kernel
DT_RANK = (D_MODEL + 15) // 16   # time_step_rank = ceil(hidden/16)
NUM_LABELS = 4
EPS = 1e-5                       # layer_norm_epsilon

LOGIT_PAD = 128                  # lane-dense logits slab (sliced outside)
XPROJ_PAD = 128                  # lane-dense fused x_proj width: dt|B|C|zeros
OUT_ROWS = 8                     # sublane-dense output slab rows per batch
PER_LAYER = 5                    # packed weight tensors per Mamba layer

# per-layer slab row layout (8 rows x 128 lanes)
_ROW_LN = D_CONV                 # 4: RMSNorm weight     (lanes 0..D_MODEL)
_ROW_CB = D_CONV + 1             # 5: conv bias          (lanes 0..D_INNER)
_ROW_D = D_CONV + 2              # 6: D skip             (lanes 0..D_INNER)
_ROW_BXP = D_CONV + 3            # 7: fused x_proj bias  (all 128 lanes)


def _sigmoid(x):
    # numerically stable logistic; divide goes to the EUP via pl.reciprocal
    e = jnp.exp(-jnp.abs(x))
    r = pl.reciprocal(1.0 + e, approx=True)
    return jnp.where(x >= 0.0, r, e * r)


def _softplus(x):
    return jnp.log1p(jnp.exp(-jnp.abs(x))) + jnp.maximum(x, 0.0)


def _rmsnorm(h, w):
    var = jnp.mean(h * h, axis=-1, keepdims=True)
    return h * jax.lax.rsqrt(var + EPS) * w


# --------------------------- fused forward kernel ---------------------------
def _fused_kernel(*refs):
    """refs = [h,                              # (L, D_MODEL) this batch's stream
               (slab, w_in, w_xproj, a_t, w_out) * N_LAYERS,
               head_slab, cls_w_pad,
               o_slab]                          # output (OUT_ROWS, LOGIT_PAD)
    """
    n_layer_refs = PER_LAYER * N_LAYERS
    h_ref = refs[0]
    layer_refs = refs[1:1 + n_layer_refs]
    head_slab_ref = refs[1 + n_layer_refs]
    cls_w_ref = refs[2 + n_layer_refs]
    o_ref = refs[-1]

    L = h_ref.shape[0]
    h = h_ref[...]                                            # (L, D) residual

    # causal-boundary row index, hoisted once (used by every conv tap mask)
    row = jax.lax.broadcasted_iota(jnp.int32, (L, 1), 0)

    for li in range(N_LAYERS):
        slab_ref, w_in_ref, w_xp_ref, a_t_ref, w_out_ref = (
            layer_refs[li * PER_LAYER:(li + 1) * PER_LAYER])
        slab = slab_ref[...]                                  # (8, 128)
        cwr = slab[0:D_CONV, :D_INNER]                        # reversed conv taps
        ln_w = slab[_ROW_LN:_ROW_LN + 1, :D_MODEL]
        conv_b = slab[_ROW_CB:_ROW_CB + 1, :D_INNER]
        d_vec = slab[_ROW_D:_ROW_D + 1, :D_INNER]
        b_xp = slab[_ROW_BXP:_ROW_BXP + 1, :]                 # (1, XPROJ_PAD)

        # ---- RMSNorm ----
        hn = _rmsnorm(h, ln_w)                                # (L, D)

        # ---- fused in_proj: one lane-dense (D, 2*D_INNER) matmul ----
        xz = jnp.dot(hn, w_in_ref[...], preferred_element_type=jnp.float32)
        x = xz[:, :D_INNER]                                   # (L, DI)
        z = xz[:, D_INNER:]                                   # gate

        # ---- causal depthwise conv1d via XLU sublane roll + boundary mask ----
        acc = conv_b + cwr[0:1, :] * x                        # tap j=0 (no shift)
        for j in range(1, D_CONV):
            xs = pltpu.roll(x, shift=j, axis=0)               # xs[t] = x[t - j]
            xs = jnp.where(row >= j, xs, 0.0)                 # zero wrapped rows
            acc = acc + cwr[j:j + 1, :] * xs
        x = acc * _sigmoid(acc)                               # SiLU(conv)

        # ---- fused x_proj: [dt | B | C | 0-pad] (dt_rank matmul folded) ----
        proj = jnp.dot(x, w_xp_ref[...],
                       preferred_element_type=jnp.float32) + b_xp
        dt = _softplus(proj[:, :D_INNER])                     # (L, DI)
        b_ssm = proj[:, D_INNER:D_INNER + D_STATE]            # (L, N)
        c_ssm = proj[:, D_INNER + D_STATE:D_INNER + 2 * D_STATE]

        a_t = a_t_ref[...]                                    # (N, DI) = -exp(A_log).T

        # ---- selective scan: discretize once for all L steps, then a serial
        #      recurrence with state (N, DI); y rows stay in registers. ----
        dA = jnp.exp(dt[:, None, :] * a_t[None, :, :])        # (L, N, DI)
        dBu = (dt * x)[:, None, :] * b_ssm[:, :, None]        # (L, N, DI)
        c_col = c_ssm[:, :, None]                             # (L, N, 1)
        # NOTE: L=8 static -> unrolled; for larger L use lax.fori_loop over
        # 8-row chunks (unroll=True on the inner chunk) to bound vreg pressure.
        state = jnp.zeros((D_STATE, D_INNER), jnp.float32)
        y_rows = []
        for l in range(L):
            state = dA[l] * state + dBu[l]
            y_rows.append(jnp.sum(c_col[l] * state, axis=0, keepdims=True))
        y = jnp.concatenate(y_rows, axis=0)                   # (L, DI) in regs

        # ---- skip (D), gate, out_proj, residual ----
        y = y + x * d_vec
        y = y * (z * _sigmoid(z))
        h = h + jnp.dot(y, w_out_ref[...], preferred_element_type=jnp.float32)

    # ---- final norm_f + mean pool over sequence (sublane reduce) + head ----
    head_slab = head_slab_ref[...]                            # (2, 128)
    nf_w = head_slab[0:1, :D_MODEL]
    cls_b = head_slab[1:2, :]
    hn = _rmsnorm(h, nf_w)
    pooled = jnp.mean(hn, axis=0, keepdims=True)              # (1, D)
    logits_row = jnp.dot(pooled, cls_w_ref[...],
                         preferred_element_type=jnp.float32) + cls_b
    # sublane+lane-dense unmasked store; row 0 is sliced outside
    o_ref[...] = jnp.broadcast_to(logits_row, (OUT_ROWS, LOGIT_PAD))


# ------------------------------ wrapper --------------------------------------
def mamba_forward_logits(packed, input_ids):
    B, L = input_ids.shape

    # embedding lookup: plain-JAX gather glue
    h3d = packed["embed"][input_ids].astype(jnp.float32)      # (B, L, D_MODEL)

    inputs = [h3d]
    for lp in packed["layers"]:
        inputs += [lp["slab"], lp["w_in"], lp["w_xproj"], lp["a_t"], lp["w_out"]]
    inputs += [packed["head_slab"], packed["cls_w_pad"]]

    # batch is a "parallel" grid axis (2-TC split on v7x); weights are
    # whole-array VMEM-resident (constant blocks -> fetched once).
    # TODO(synk): when scaling depth, stack per-layer weights and add an
    #   "arbitrary" layer grid axis so they stream HBM->VMEM double-buffered.
    in_specs = [pl.BlockSpec((None, L, D_MODEL), lambda b: (b, 0, 0))]
    in_specs += [pl.BlockSpec(memory_space=pltpu.MemorySpace.VMEM)
                 for _ in inputs[1:]]

    out = pl.pallas_call(
        _fused_kernel,
        grid=(B,),
        out_shape=jax.ShapeDtypeStruct((B, OUT_ROWS, LOGIT_PAD), jnp.float32),
        in_specs=in_specs,
        out_specs=pl.BlockSpec((None, OUT_ROWS, LOGIT_PAD), lambda b: (b, 0, 0)),
        compiler_params=pltpu.CompilerParams(
            dimension_semantics=("parallel",),
            vmem_limit_bytes=32 * 1024 * 1024),
    )(*inputs)
    return out[:, 0, :NUM_LABELS]


# ------------------------------ parameters -----------------------------------
def init_params(key):
    """Raw parameters with the same parameterization as the PyTorch module."""
    ks = jax.random.split(key, 4 + N_LAYERS)

    def dense(k, shape, scale=0.02):
        return jax.random.normal(k, shape, jnp.float32) * scale

    params = {"embed": dense(ks[0], (VOCAB, D_MODEL))}
    layers = []
    for i in range(N_LAYERS):
        kk = jax.random.split(ks[1 + i], 8)
        A = jnp.tile(jnp.arange(1, D_STATE + 1, dtype=jnp.float32)[None, :],
                     (D_INNER, 1))
        layers.append(dict(
            ln_w=jnp.ones((1, D_MODEL), jnp.float32),
            w_in_x=dense(kk[0], (D_MODEL, D_INNER)),
            w_in_z=dense(kk[1], (D_MODEL, D_INNER)),
            conv_w=dense(kk[2], (D_CONV, D_INNER), 0.1),
            conv_b=jnp.zeros((1, D_INNER), jnp.float32),
            w_dt=dense(kk[3], (D_INNER, DT_RANK)),
            w_b=dense(kk[4], (D_INNER, D_STATE)),
            w_c=dense(kk[5], (D_INNER, D_STATE)),
            dtproj_w=dense(kk[6], (DT_RANK, D_INNER), 0.1),
            dtproj_b=jnp.full((1, D_INNER), -2.0, jnp.float32),
            a_log=jnp.log(A),
            d=jnp.ones((1, D_INNER), jnp.float32),
            w_out=dense(kk[7], (D_INNER, D_MODEL)),
        ))
    params["layers"] = layers
    params["norm_f_w"] = jnp.ones((1, D_MODEL), jnp.float32)
    params["cls_w"] = dense(ks[2], (D_MODEL, NUM_LABELS))
    params["cls_b"] = jnp.zeros((1, NUM_LABELS), jnp.float32)
    return params


def _pad_lanes(a, width=128):
    return jnp.concatenate(
        [a, jnp.zeros((a.shape[0], width - a.shape[1]), jnp.float32)], axis=1)


def pack_params(p):
    """Fold / fuse raw parameters into the lane-dense layout the kernel eats.

    (When scaling D_MODEL/D_INNER, store these in bf16 and keep
     preferred_element_type=f32 in the kernel matmuls.)
    """
    packed = {"embed": p["embed"]}
    layers = []
    for lp in p["layers"]:
        # fold the dt_rank bottleneck: x @ w_dt @ dtproj_w == x @ (w_dt@dtproj_w)
        w_dt_full = jnp.dot(lp["w_dt"], lp["dtproj_w"])       # (DI, DI)
        w_xproj = _pad_lanes(
            jnp.concatenate([w_dt_full, lp["w_b"], lp["w_c"]], axis=1),
            XPROJ_PAD)                                        # (DI, 128)
        b_xproj = _pad_lanes(lp["dtproj_b"], XPROJ_PAD)       # (1, 128)
        # pack all tiny per-layer row-vectors + reversed conv taps in one slab
        slab = jnp.concatenate([
            _pad_lanes(lp["conv_w"][::-1]),                   # rows 0..K-1
            _pad_lanes(lp["ln_w"]),                           # row 4
            _pad_lanes(lp["conv_b"]),                         # row 5
            _pad_lanes(lp["d"]),                              # row 6
            b_xproj,                                          # row 7
        ], axis=0)                                            # (8, 128)
        layers.append(dict(
            slab=slab,
            w_in=jnp.concatenate([lp["w_in_x"], lp["w_in_z"]], axis=1),  # (D, 2DI)
            w_xproj=w_xproj,
            a_t=(-jnp.exp(lp["a_log"])).T,                    # (N, DI)
            w_out=lp["w_out"],                                # (DI, D)
        ))
    packed["layers"] = layers
    packed["head_slab"] = jnp.concatenate([
        _pad_lanes(p["norm_f_w"], LOGIT_PAD),                 # row 0: norm_f
        _pad_lanes(p["cls_b"], LOGIT_PAD),                    # row 1: cls bias
    ], axis=0)                                                # (2, 128)
    packed["cls_w_pad"] = _pad_lanes(p["cls_w"], LOGIT_PAD)   # (D, 128)
    return packed


# ------------------------------- forward -------------------------------------
def forward(packed, input_ids, attention_mask=None, labels=None):
    # attention_mask is forwarded as cache_position in the PyTorch module and
    # does not change the produced hidden states; ignored here (matches spec).
    logits = mamba_forward_logits(packed, input_ids)
    if labels is None:
        ClassificationOutput = namedtuple("ClassificationOutput", ["logits"])
        return ClassificationOutput(logits=logits)
    # nn.CrossEntropyLoss (mean reduction) -- plain-JAX glue
    logp = jax.nn.log_softmax(logits, axis=-1)
    loss = -jnp.mean(jnp.take_along_axis(logp, labels[:, None], axis=-1))
    ClassificationOutput = namedtuple("ClassificationOutput", ["loss", "logits"])
    return ClassificationOutput(loss=loss, logits=logits)


if __name__ == "__main__":
    key = jax.random.PRNGKey(0)
    pkey, dkey = jax.random.split(key)
    params = pack_params(init_params(pkey))

    B, L = 2, 8
    input_ids = jax.random.randint(dkey, (B, L), 0, VOCAB, dtype=jnp.int32)

    out = jax.jit(forward)(params, input_ids)
    logits = jax.block_until_ready(out.logits)
    assert logits.shape == (B, NUM_LABELS)
    assert bool(jnp.all(jnp.isfinite(logits)))
    print("KERNEL_OK")
</pallas_src>

<mosaic_0001>
module attributes {stable_mosaic.version = 11 : i64} {
  func.func @_fused_kernel(%arg0: i32, %arg1: memref<1x8x32xf32, #tpu.memory_space<vmem>>, %arg2: memref<8x128xf32, #tpu.memory_space<vmem>>, %arg3: memref<32x128xf32, #tpu.memory_space<vmem>>, %arg4: memref<64x128xf32, #tpu.memory_space<vmem>>, %arg5: memref<16x64xf32, #tpu.memory_space<vmem>>, %arg6: memref<64x32xf32, #tpu.memory_space<vmem>>, %arg7: memref<8x128xf32, #tpu.memory_space<vmem>>, %arg8: memref<32x128xf32, #tpu.memory_space<vmem>>, %arg9: memref<64x128xf32, #tpu.memory_space<vmem>>, %arg10: memref<16x64xf32, #tpu.memory_space<vmem>>, %arg11: memref<64x32xf32, #tpu.memory_space<vmem>>, %arg12: memref<2x128xf32, #tpu.memory_space<vmem>>, %arg13: memref<32x128xf32, #tpu.memory_space<vmem>>, %arg14: memref<1x8x128xf32, #tpu.memory_space<vmem>>) attributes {dimension_semantics = [#tpu.dimension_semantics<parallel>], iteration_bounds = array<i64: 2>, scalar_prefetch = 0 : i64, scratch_operands = 0 : i64, tpu.core_type = #tpu.core_type<tc>, window_params = [{transform_indices = @transform_0, window_bounds = array<i64: 1, 8, 32>}, {pipeline_mode = #tpu.pipeline_mode<synchronous>, transform_indices = @transform_1, window_bounds = array<i64: 8, 128>}, {pipeline_mode = #tpu.pipeline_mode<synchronous>, transform_indices = @transform_2, window_bounds = array<i64: 32, 128>}, {pipeline_mode = #tpu.pipeline_mode<synchronous>, transform_indices = @transform_3, window_bounds = array<i64: 64, 128>}, {pipeline_mode = #tpu.pipeline_mode<synchronous>, transform_indices = @transform_4, window_bounds = array<i64: 16, 64>}, {pipeline_mode = #tpu.pipeline_mode<synchronous>, transform_indices = @transform_5, window_bounds = array<i64: 64, 32>}, {pipeline_mode = #tpu.pipeline_mode<synchronous>, transform_indices = @transform_6, window_bounds = array<i64: 8, 128>}, {pipeline_mode = #tpu.pipeline_mode<synchronous>, transform_indices = @transform_7, window_bounds = array<i64: 32, 128>}, {pipeline_mode = #tpu.pipeline_mode<synchronous>, transform_indices = @transform_8, window_bounds = array<i64: 64, 128>}, {pipeline_mode = #tpu.pipeline_mode<synchronous>, transform_indices = @transform_9, window_bounds = array<i64: 16, 64>}, {pipeline_mode = #tpu.pipeline_mode<synchronous>, transform_indices = @transform_10, window_bounds = array<i64: 64, 32>}, {pipeline_mode = #tpu.pipeline_mode<synchronous>, transform_indices = @transform_11, window_bounds = array<i64: 2, 128>}, {pipeline_mode = #tpu.pipeline_mode<synchronous>, transform_indices = @transform_12, window_bounds = array<i64: 32, 128>}, {transform_indices = @transform_13, window_bounds = array<i64: 1, 8, 128>}]} {
    %c0 = arith.constant 0 : index
    %c0_0 = arith.constant 0 : index
    %c0_1 = arith.constant 0 : index
    %0 = vector.load %arg1[%c0, %c0_0, %c0_1] : memref<1x8x32xf32, #tpu.memory_space<vmem>>, vector<1x8x32xf32>
    %1 = vector.shape_cast %0 : vector<1x8x32xf32> to vector<8x32xf32>
    %2 = tpu.iota {dimensions = array<i32: 0>} : vector<8x1xi32>
    %c0_2 = arith.constant 0 : index
    %c0_3 = arith.constant 0 : index
    %3 = vector.load %arg2[%c0_2, %c0_3] : memref<8x128xf32, #tpu.memory_space<vmem>>, vector<8x128xf32>
    %4 = vector.extract_strided_slice %3 {offsets = [0, 0], sizes = [4, 64], strides = [1, 1]} : vector<8x128xf32> to vector<4x64xf32>
    %5 = vector.extract_strided_slice %3 {offsets = [4, 0], sizes = [1, 32], strides = [1, 1]} : vector<8x128xf32> to vector<1x32xf32>
    %6 = vector.extract_strided_slice %3 {offsets = [5, 0], sizes = [1, 64], strides = [1, 1]} : vector<8x128xf32> to vector<1x64xf32>
    %7 = vector.extract_strided_slice %3 {offsets = [6, 0], sizes = [1, 64], strides = [1, 1]} : vector<8x128xf32> to vector<1x64xf32>
    %8 = vector.extract_strided_slice %3 {offsets = [7, 0], sizes = [1, 128], strides = [1, 1]} : vector<8x128xf32> to vector<1x128xf32>
    %9 = arith.mulf %1, %1 : vector<8x32xf32>
    %cst = arith.constant dense<0.000000e+00> : vector<8xf32>
    %10 = vector.multi_reduction <add>, %9, %cst [1] : vector<8x32xf32> to vector<8xf32>
    %11 = vector.shape_cast %10 : vector<8xf32> to vector<8x1xf32>
    %cst_4 = arith.constant 3.200000e+01 : f32
    %12 = vector.broadcast %cst_4 : f32 to vector<8x1xf32>
    %13 = arith.divf %11, %12 : vector<8x1xf32>
    %cst_5 = arith.constant 9.99999974E-6 : f32
    %14 = vector.broadcast %cst_5 : f32 to vector<8x1xf32>
    %15 = arith.addf %13, %14 : vector<8x1xf32>
    %16 = math.rsqrt %15 : vector<8x1xf32>
    %17 = vector.broadcast %16 : vector<8x1xf32> to vector<8x32xf32>
    %18 = arith.mulf %1, %17 : vector<8x32xf32>
    %19 = vector.broadcast %5 : vector<1x32xf32> to vector<8x32xf32>
    %20 = arith.mulf %18, %19 : vector<8x32xf32>
    %c0_6 = arith.constant 0 : index
    %c0_7 = arith.constant 0 : index
    %21 = vector.load %arg3[%c0_6, %c0_7] : memref<32x128xf32, #tpu.memory_space<vmem>>, vector<32x128xf32>
    %cst_8 = arith.constant dense<0.000000e+00> : vector<8x128xf32>
    %22 = tpu.matmul %20, %21, %cst_8 {dimension_numbers = #tpu.dot_dimension_numbers<[1], [0], [0], [1], [0, 0, 1, 1], [], []>} : vector<8x32xf32>, vector<32x128xf32>, vector<8x128xf32> -> vector<8x128xf32>
    %23 = vector.extract_strided_slice %22 {offsets = [0, 0], sizes = [8, 64], strides = [1, 1]} : vector<8x128xf32> to vector<8x64xf32>
    %24 = vector.extract_strided_slice %22 {offsets = [0, 64], sizes = [8, 64], strides = [1, 1]} : vector<8x128xf32> to vector<8x64xf32>
    %25 = vector.extract_strided_slice %4 {offsets = [0, 0], sizes = [1, 64], strides = [1, 1]} : vector<4x64xf32> to vector<1x64xf32>
    %26 = vector.broadcast %25 : vector<1x64xf32> to vector<8x64xf32>
    %27 = arith.mulf %26, %23 : vector<8x64xf32>
    %28 = vector.broadcast %6 : vector<1x64xf32> to vector<8x64xf32>
    %29 = arith.addf %28, %27 : vector<8x64xf32>
    %c1_i32 = arith.constant 1 : i32
    %30 = tpu.dynamic_rotate %23 by %c1_i32 dim 0 : vector<8x64xf32>, i32 -> vector<8x64xf32>
    %c1_i32_9 = arith.constant 1 : i32
    %31 = vector.broadcast %c1_i32_9 : i32 to vector<8x1xi32>
    %32 = arith.cmpi sge, %2, %31 : vector<8x1xi32>
    %cst_10 = arith.constant 0.000000e+00 : f32
    %33 = vector.shape_cast %32 : vector<8x1xi1> to vector<8x1xi1>
    %34 = vector.broadcast %33 : vector<8x1xi1> to vector<8x64xi1>
    %35 = vector.broadcast %cst_10 : f32 to vector<8x64xf32>
    %36 = arith.select %34, %30, %35 : vector<8x64xi1>, vector<8x64xf32>
    %37 = vector.extract_strided_slice %4 {offsets = [1, 0], sizes = [1, 64], strides = [1, 1]} : vector<4x64xf32> to vector<1x64xf32>
    %38 = vector.broadcast %37 : vector<1x64xf32> to vector<8x64xf32>
    %39 = arith.mulf %38, %36 : vector<8x64xf32>
    %40 = arith.addf %29, %39 : vector<8x64xf32>
    %c2_i32 = arith.constant 2 : i32
    %41 = tpu.dynamic_rotate %23 by %c2_i32 dim 0 : vector<8x64xf32>, i32 -> vector<8x64xf32>
    %c2_i32_11 = arith.constant 2 : i32
    %42 = vector.broadcast %c2_i32_11 : i32 to vector<8x1xi32>
    %43 = arith.cmpi sge, %2, %42 : vector<8x1xi32>
    %cst_12 = arith.constant 0.000000e+00 : f32
    %44 = vector.shape_cast %43 : vector<8x1xi1> to vector<8x1xi1>
    %45 = vector.broadcast %44 : vector<8x1xi1> to vector<8x64xi1>
    %46 = vector.broadcast %cst_12 : f32 to vector<8x64xf32>
    %47 = arith.select %45, %41, %46 : vector<8x64xi1>, vector<8x64xf32>
    %48 = vector.extract_strided_slice %4 {offsets = [2, 0], sizes = [1, 64], strides = [1, 1]} : vector<4x64xf32> to vector<1x64xf32>
    %49 = vector.broadcast %48 : vector<1x64xf32> to vector<8x64xf32>
    %50 = arith.mulf %49, %47 : vector<8x64xf32>
    %51 = arith.addf %40, %50 : vector<8x64xf32>
    %c3_i32 = arith.constant 3 : i32
    %52 = tpu.dynamic_rotate %23 by %c3_i32 dim 0 : vector<8x64xf32>, i32 -> vector<8x64xf32>
    %c3_i32_13 = arith.constant 3 : i32
    %53 = vector.broadcast %c3_i32_13 : i32 to vector<8x1xi32>
    %54 = arith.cmpi sge, %2, %53 : vector<8x1xi32>
    %cst_14 = arith.constant 0.000000e+00 : f32
    %55 = vector.shape_cast %54 : vector<8x1xi1> to vector<8x1xi1>
    %56 = vector.broadcast %55 : vector<8x1xi1> to vector<8x64xi1>
    %57 = vector.broadcast %cst_14 : f32 to vector<8x64xf32>
    %58 = arith.select %56, %52, %57 : vector<8x64xi1>, vector<8x64xf32>
    %59 = vector.extract_strided_slice %4 {offsets = [3, 0], sizes = [1, 64], strides = [1, 1]} : vector<4x64xf32> to vector<1x64xf32>
    %60 = vector.broadcast %59 : vector<1x64xf32> to vector<8x64xf32>
    %61 = arith.mulf %60, %58 : vector<8x64xf32>
    %62 = arith.addf %51, %61 : vector<8x64xf32>
    %63 = math.absf %62 : vector<8x64xf32>
    %cst_15 = arith.constant 0.000000e+00 : f32
    %64 = vector.broadcast %cst_15 : f32 to vector<8x64xf32>
    %65 = arith.subf %64, %63 : vector<8x64xf32>
    %66 = math.exp %65 : vector<8x64xf32>
    %cst_16 = arith.constant 1.000000e+00 : f32
    %67 = vector.broadcast %cst_16 : f32 to vector<8x64xf32>
    %68 = arith.addf %67, %66 : vector<8x64xf32>
    %69 = tpu.reciprocal %68 {approx = true} : vector<8x64xf32> -> vector<8x64xf32>
    %cst_17 = arith.constant 0.000000e+00 : f32
    %70 = vector.broadcast %cst_17 : f32 to vector<8x64xf32>
    %71 = arith.cmpf oge, %62, %70 : vector<8x64xf32>
    %72 = arith.mulf %66, %69 : vector<8x64xf32>
    %73 = arith.select %71, %69, %72 : vector<8x64xi1>, vector<8x64xf32>
    %74 = arith.mulf %62, %73 : vector<8x64xf32>
    %c0_18 = arith.constant 0 : index
    %c0_19 = arith.constant 0 : index
    %75 = vector.load %arg4[%c0_18, %c0_19] : memref<64x128xf32, #tpu.memory_space<vmem>>, vector<64x128xf32>
    %cst_20 = arith.constant dense<0.000000e+00> : vector<8x128xf32>
    %76 = tpu.matmul %74, %75, %cst_20 {dimension_numbers = #tpu.dot_dimension_numbers<[1], [0], [0], [1], [0, 0, 1, 1], [], []>} : vector<8x64xf32>, vector<64x128xf32>, vector<8x128xf32> -> vector<8x128xf32>
    %77 = vector.broadcast %8 : vector<1x128xf32> to vector<8x128xf32>
    %78 = arith.addf %76, %77 : vector<8x128xf32>
    %79 = vector.extract_strided_slice %78 {offsets = [0, 0], sizes = [8, 64], strides = [1, 1]} : vector<8x128xf32> to vector<8x64xf32>
    %80 = math.absf %79 : vector<8x64xf32>
    %cst_21 = arith.constant 0.000000e+00 : f32
    %81 = vector.broadcast %cst_21 : f32 to vector<8x64xf32>
    %82 = arith.subf %81, %80 : vector<8x64xf32>
    %83 = math.exp %82 : vector<8x64xf32>
    %84 = math.log1p %83 : vector<8x64xf32>
    %cst_22 = arith.constant 0.000000e+00 : f32
    %85 = vector.broadcast %cst_22 : f32 to vector<8x64xf32>
    %86 = arith.maximumf %79, %85 : vector<8x64xf32>
    %87 = arith.addf %84, %86 : vector<8x64xf32>
    %88 = vector.extract_strided_slice %78 {offsets = [0, 64], sizes = [8, 16], strides = [1, 1]} : vector<8x128xf32> to vector<8x16xf32>
    %89 = vector.extract_strided_slice %78 {offsets = [0, 80], sizes = [8, 16], strides = [1, 1]} : vector<8x128xf32> to vector<8x16xf32>
    %c0_23 = arith.constant 0 : index
    %c0_24 = arith.constant 0 : index
    %90 = vector.load %arg5[%c0_23, %c0_24] : memref<16x64xf32, #tpu.memory_space<vmem>>, vector<16x64xf32>
    %91 = vector.shape_cast %87 : vector<8x64xf32> to vector<8x1x64xf32>
    %92 = vector.shape_cast %90 : vector<16x64xf32> to vector<1x16x64xf32>
    %93 = vector.broadcast %91 : vector<8x1x64xf32> to vector<8x16x64xf32>
    %94 = vector.broadcast %92 : vector<1x16x64xf32> to vector<8x16x64xf32>
    %95 = arith.mulf %93, %94 : vector<8x16x64xf32>
    %96 = math.exp %95 : vector<8x16x64xf32>
    %97 = arith.mulf %87, %74 : vector<8x64xf32>
    %98 = vector.shape_cast %97 : vector<8x64xf32> to vector<8x1x64xf32>
    %99 = vector.shape_cast %88 : vector<8x16xf32> to vector<8x16x1xf32>
    %100 = vector.broadcast %98 : vector<8x1x64xf32> to vector<8x16x64xf32>
    %101 = vector.broadcast %99 : vector<8x16x1xf32> to vector<8x16x64xf32>
    %102 = arith.mulf %100, %101 : vector<8x16x64xf32>
    %103 = vector.shape_cast %89 : vector<8x16xf32> to vector<8x16x1xf32>
    %cst_25 = arith.constant 0.000000e+00 : f32
    %104 = vector.broadcast %cst_25 : f32 to vector<16x64xf32>
    %105 = vector.extract_strided_slice %96 {offsets = [0, 0, 0], sizes = [1, 16, 64], strides = [1, 1, 1]} : vector<8x16x64xf32> to vector<1x16x64xf32>
    %106 = vector.shape_cast %105 : vector<1x16x64xf32> to vector<16x64xf32>
    %107 = arith.mulf %106, %104 : vector<16x64xf32>
    %108 = vector.extract_strided_slice %102 {offsets = [0, 0, 0], sizes = [1, 16, 64], strides = [1, 1, 1]} : vector<8x16x64xf32> to vector<1x16x64xf32>
    %109 = vector.shape_cast %108 : vector<1x16x64xf32> to vector<16x64xf32>
    %110 = arith.addf %107, %109 : vector<16x64xf32>
    %111 = vector.extract_strided_slice %103 {offsets = [0, 0, 0], sizes = [1, 16, 1], strides = [1, 1, 1]} : vector<8x16x1xf32> to vector<1x16x1xf32>
    %112 = vector.shape_cast %111 : vector<1x16x1xf32> to vector<16x1xf32>
    %113 = vector.broadcast %112 : vector<16x1xf32> to vector<16x64xf32>
    %114 = arith.mulf %113, %110 : vector<16x64xf32>
    %cst_26 = arith.constant dense<0.000000e+00> : vector<64xf32>
    %115 = vector.multi_reduction <add>, %114, %cst_26 [0] : vector<16x64xf32> to vector<64xf32>
    %116 = vector.shape_cast %115 : vector<64xf32> to vector<1x64xf32>
    %117 = vector.extract_strided_slice %96 {offsets = [1, 0, 0], sizes = [1, 16, 64], strides = [1, 1, 1]} : vector<8x16x64xf32> to vector<1x16x64xf32>
    %118 = vector.shape_cast %117 : vector<1x16x64xf32> to vector<16x64xf32>
    %119 = arith.mulf %118, %110 : vector<16x64xf32>
    %120 = vector.extract_strided_slice %102 {offsets = [1, 0, 0], sizes = [1, 16, 64], strides = [1, 1, 1]} : vector<8x16x64xf32> to vector<1x16x64xf32>
    %121 = vector.shape_cast %120 : vector<1x16x64xf32> to vector<16x64xf32>
    %122 = arith.addf %119, %121 : vector<16x64xf32>
    %123 = vector.extract_strided_slice %103 {offsets = [1, 0, 0], sizes = [1, 16, 1], strides = [1, 1, 1]} : vector<8x16x1xf32> to vector<1x16x1xf32>
    %124 = vector.shape_cast %123 : vector<1x16x1xf32> to vector<16x1xf32>
    %125 = vector.broadcast %124 : vector<16x1xf32> to vector<16x64xf32>
    %126 = arith.mulf %125, %122 : vector<16x64xf32>
    %cst_27 = arith.constant dense<0.000000e+00> : vector<64xf32>
    %127 = vector.multi_reduction <add>, %126, %cst_27 [0] : vector<16x64xf32> to vector<64xf32>
    %128 = vector.shape_cast %127 : vector<64xf32> to vector<1x64xf32>
    %129 = vector.extract_strided_slice %96 {offsets = [2, 0, 0], sizes = [1, 16, 64], strides = [1, 1, 1]} : vector<8x16x64xf32> to vector<1x16x64xf32>
    %130 = vector.shape_cast %129 : vector<1x16x64xf32> to vector<16x64xf32>
    %131 = arith.mulf %130, %122 : vector<16x64xf32>
    %132 = vector.extract_strided_slice %102 {offsets = [2, 0, 0], sizes = [1, 16, 64], strides = [1, 1, 1]} : vector<8x16x64xf32> to vector<1x16x64xf32>
    %133 = vector.shape_cast %132 : vector<1x16x64xf32> to vector<16x64xf32>
    %134 = arith.addf %131, %133 : vector<16x64xf32>
    %135 = vector.extract_strided_slice %103 {offsets = [2, 0, 0], sizes = [1, 16, 1], strides = [1, 1, 1]} : vector<8x16x1xf32> to vector<1x16x1xf32>
    %136 = vector.shape_cast %135 : vector<1x16x1xf32> to vector<16x1xf32>
    %137 = vector.broadcast %136 : vector<16x1xf32> to vector<16x64xf32>
    %138 = arith.mulf %137, %134 : vector<16x64xf32>
    %cst_28 = arith.constant dense<0.000000e+00> : vector<64xf32>
    %139 = vector.multi_reduction <add>, %138, %cst_28 [0] : vector<16x64xf32> to vector<64xf32>
    %140 = vector.shape_cast %139 : vector<64xf32> to vector<1x64xf32>
    %141 = vector.extract_strided_slice %96 {offsets = [3, 0, 0], sizes = [1, 16, 64], strides = [1, 1, 1]} : vector<8x16x64xf32> to vector<1x16x64xf32>
    %142 = vector.shape_cast %141 : vector<1x16x64xf32> to vector<16x64xf32>
    %143 = arith.mulf %142, %134 : vector<16x64xf32>
    %144 = vector.extract_strided_slice %102 {offsets = [3, 0, 0], sizes = [1, 16, 64], strides = [1, 1, 1]} : vector<8x16x64xf32> to vector<1x16x64xf32>
    %145 = vector.shape_cast %144 : vector<1x16x64xf32> to vector<16x64xf32>
    %146 = arith.addf %143, %145 : vector<16x64xf32>
    %147 = vector.extract_strided_slice %103 {offsets = [3, 0, 0], sizes = [1, 16, 1], strides = [1, 1, 1]} : vector<8x16x1xf32> to vector<1x16x1xf32>
    %148 = vector.shape_cast %147 : vector<1x16x1xf32> to vector<16x1xf32>
    %149 = vector.broadcast %148 : vector<16x1xf32> to vector<16x64xf32>
    %150 = arith.mulf %149, %146 : vector<16x64xf32>
    %cst_29 = arith.constant dense<0.000000e+00> : vector<64xf32>
    %151 = vector.multi_reduction <add>, %150, %cst_29 [0] : vector<16x64xf32> to vector<64xf32>
    %152 = vector.shape_cast %151 : vector<64xf32> to vector<1x64xf32>
    %153 = vector.extract_strided_slice %96 {offsets = [4, 0, 0], sizes = [1, 16, 64], strides = [1, 1, 1]} : vector<8x16x64xf32> to vector<1x16x64xf32>
    %154 = vector.shape_cast %153 : vector<1x16x64xf32> to vector<16x64xf32>
    %155 = arith.mulf %154, %146 : vector<16x64xf32>
    %156 = vector.extract_strided_slice %102 {offsets = [4, 0, 0], sizes = [1, 16, 64], strides = [1, 1, 1]} : vector<8x16x64xf32> to vector<1x16x64xf32>
    %157 = vector.shape_cast %156 : vector<1x16x64xf32> to vector<16x64xf32>
    %158 = arith.addf %155, %157 : vector<16x64xf32>
    %159 = vector.extract_strided_slice %103 {offsets = [4, 0, 0], sizes = [1, 16, 1], strides = [1, 1, 1]} : vector<8x16x1xf32> to vector<1x16x1xf32>
    %160 = vector.shape_cast %159 : vector<1x16x1xf32> to vector<16x1xf32>
    %161 = vector.broadcast %160 : vector<16x1xf32> to vector<16x64xf32>
    %162 = arith.mulf %161, %158 : vector<16x64xf32>
    %cst_30 = arith.constant dense<0.000000e+00> : vector<64xf32>
    %163 = vector.multi_reduction <add>, %162, %cst_30 [0] : vector<16x64xf32> to vector<64xf32>
    %164 = vector.shape_cast %163 : vector<64xf32> to vector<1x64xf32>
    %165 = vector.extract_strided_slice %96 {offsets = [5, 0, 0], sizes = [1, 16, 64], strides = [1, 1, 1]} : vector<8x16x64xf32> to vector<1x16x64xf32>
    %166 = vector.shape_cast %165 : vector<1x16x64xf32> to vector<16x64xf32>
    %167 = arith.mulf %166, %158 : vector<16x64xf32>
    %168 = vector.extract_strided_slice %102 {offsets = [5, 0, 0], sizes = [1, 16, 64], strides = [1, 1, 1]} : vector<8x16x64xf32> to vector<1x16x64xf32>
    %169 = vector.shape_cast %168 : vector<1x16x64xf32> to vector<16x64xf32>
    %170 = arith.addf %167, %169 : vector<16x64xf32>
    %171 = vector.extract_strided_slice %103 {offsets = [5, 0, 0], sizes = [1, 16, 1], strides = [1, 1, 1]} : vector<8x16x1xf32> to vector<1x16x1xf32>
    %172 = vector.shape_cast %171 : vector<1x16x1xf32> to vector<16x1xf32>
    %173 = vector.broadcast %172 : vector<16x1xf32> to vector<16x64xf32>
    %174 = arith.mulf %173, %170 : vector<16x64xf32>
    %cst_31 = arith.constant dense<0.000000e+00> : vector<64xf32>
    %175 = vector.multi_reduction <add>, %174, %cst_31 [0] : vector<16x64xf32> to vector<64xf32>
    %176 = vector.shape_cast %175 : vector<64xf32> to vector<1x64xf32>
    %177 = vector.extract_strided_slice %96 {offsets = [6, 0, 0], sizes = [1, 16, 64], strides = [1, 1, 1]} : vector<8x16x64xf32> to vector<1x16x64xf32>
    %178 = vector.shape_cast %177 : vector<1x16x64xf32> to vector<16x64xf32>
    %179 = arith.mulf %178, %170 : vector<16x64xf32>
    %180 = vector.extract_strided_slice %102 {offsets = [6, 0, 0], sizes = [1, 16, 64], strides = [1, 1, 1]} : vector<8x16x64xf32> to vector<1x16x64xf32>
    %181 = vector.shape_cast %180 : vector<1x16x64xf32> to vector<16x64xf32>
    %182 = arith.addf %179, %181 : vector<16x64xf32>
    %183 = vector.extract_strided_slice %103 {offsets = [6, 0, 0], sizes = [1, 16, 1], strides = [1, 1, 1]} : vector<8x16x1xf32> to vector<1x16x1xf32>
    %184 = vector.shape_cast %183 : vector<1x16x1xf32> to vector<16x1xf32>
    %185 = vector.broadcast %184 : vector<16x1xf32> to vector<16x64xf32>
    %186 = arith.mulf %185, %182 : vector<16x64xf32>
    %cst_32 = arith.constant dense<0.000000e+00> : vector<64xf32>
    %187 = vector.multi_reduction <add>, %186, %cst_32 [0] : vector<16x64xf32> to vector<64xf32>
    %188 = vector.shape_cast %187 : vector<64xf32> to vector<1x64xf32>
    %189 = vector.extract_strided_slice %96 {offsets = [7, 0, 0], sizes = [1, 16, 64], strides = [1, 1, 1]} : vector<8x16x64xf32> to vector<1x16x64xf32>
    %190 = vector.shape_cast %189 : vector<1x16x64xf32> to vector<16x64xf32>
    %191 = arith.mulf %190, %182 : vector<16x64xf32>
    %192 = vector.extract_strided_slice %102 {offsets = [7, 0, 0], sizes = [1, 16, 64], strides = [1, 1, 1]} : vector<8x16x64xf32> to vector<1x16x64xf32>
    %193 = vector.shape_cast %192 : vector<1x16x64xf32> to vector<16x64xf32>
    %194 = arith.addf %191, %193 : vector<16x64xf32>
    %195 = vector.extract_strided_slice %103 {offsets = [7, 0, 0], sizes = [1, 16, 1], strides = [1, 1, 1]} : vector<8x16x1xf32> to vector<1x16x1xf32>
    %196 = vector.shape_cast %195 : vector<1x16x1xf32> to vector<16x1xf32>
    %197 = vector.broadcast %196 : vector<16x1xf32> to vector<16x64xf32>
    %198 = arith.mulf %197, %194 : vector<16x64xf32>
    %cst_33 = arith.constant dense<0.000000e+00> : vector<64xf32>
    %199 = vector.multi_reduction <add>, %198, %cst_33 [0] : vector<16x64xf32> to vector<64xf32>
    %200 = vector.shape_cast %199 : vector<64xf32> to vector<1x64xf32>
    %201 = tpu.concatenate %116, %128, %140, %152, %164, %176, %188, %200 in 0 : vector<1x64xf32>, vector<1x64xf32>, vector<1x64xf32>, vector<1x64xf32>, vector<1x64xf32>, vector<1x64xf32>, vector<1x64xf32>, vector<1x64xf32> -> vector<8x64xf32>
    %202 = vector.broadcast %7 : vector<1x64xf32> to vector<8x64xf32>
    %203 = arith.mulf %74, %202 : vector<8x64xf32>
    %204 = arith.addf %201, %203 : vector<8x64xf32>
    %205 = math.absf %24 : vector<8x64xf32>
    %cst_34 = arith.constant 0.000000e+00 : f32
    %206 = vector.broadcast %cst_34 : f32 to vector<8x64xf32>
    %207 = arith.subf %206, %205 : vector<8x64xf32>
    %208 = math.exp %207 : vector<8x64xf32>
    %cst_35 = arith.constant 1.000000e+00 : f32
    %209 = vector.broadcast %cst_35 : f32 to vector<8x64xf32>
    %210 = arith.addf %209, %208 : vector<8x64xf32>
    %211 = tpu.reciprocal %210 {approx = true} : vector<8x64xf32> -> vector<8x64xf32>
    %cst_36 = arith.constant 0.000000e+00 : f32
    %212 = vector.broadcast %cst_36 : f32 to vector<8x64xf32>
    %213 = arith.cmpf oge, %24, %212 : vector<8x64xf32>
    %214 = arith.mulf %208, %211 : vector<8x64xf32>
    %215 = arith.select %213, %211, %214 : vector<8x64xi1>, vector<8x64xf32>
    %216 = arith.mulf %24, %215 : vector<8x64xf32>
    %217 = arith.mulf %204, %216 : vector<8x64xf32>
    %c0_37 = arith.constant 0 : index
    %c0_38 = arith.constant 0 : index
    %218 = vector.load %arg6[%c0_37, %c0_38] : memref<64x32xf32, #tpu.memory_space<vmem>>, vector<64x32xf32>
    %cst_39 = arith.constant dense<0.000000e+00> : vector<8x32xf32>
    %219 = tpu.matmul %217, %218, %cst_39 {dimension_numbers = #tpu.dot_dimension_numbers<[1], [0], [0], [1], [0, 0, 1, 1], [], []>} : vector<8x64xf32>, vector<64x32xf32>, vector<8x32xf32> -> vector<8x32xf32>
    %220 = arith.addf %1, %219 : vector<8x32xf32>
    %c0_40 = arith.constant 0 : index
    %c0_41 = arith.constant 0 : index
    %221 = vector.load %arg7[%c0_40, %c0_41] : memref<8x128xf32, #tpu.memory_space<vmem>>, vector<8x128xf32>
    %222 = vector.extract_strided_slice %221 {offsets = [0, 0], sizes = [4, 64], strides = [1, 1]} : vector<8x128xf32> to vector<4x64xf32>
    %223 = vector.extract_strided_slice %221 {offsets = [4, 0], sizes = [1, 32], strides = [1, 1]} : vector<8x128xf32> to vector<1x32xf32>
    %224 = vector.extract_strided_slice %221 {offsets = [5, 0], sizes = [1, 64], strides = [1, 1]} : vector<8x128xf32> to vector<1x64xf32>
    %225 = vector.extract_strided_slice %221 {offsets = [6, 0], sizes = [1, 64], strides = [1, 1]} : vector<8x128xf32> to vector<1x64xf32>
    %226 = vector.extract_strided_slice %221 {offsets = [7, 0], sizes = [1, 128], strides = [1, 1]} : vector<8x128xf32> to vector<1x128xf32>
    %227 = arith.mulf %220, %220 : vector<8x32xf32>
    %cst_42 = arith.constant dense<0.000000e+00> : vector<8xf32>
    %228 = vector.multi_reduction <add>, %227, %cst_42 [1] : vector<8x32xf32> to vector<8xf32>
    %229 = vector.shape_cast %228 : vector<8xf32> to vector<8x1xf32>
    %cst_43 = arith.constant 3.200000e+01 : f32
    %230 = vector.broadcast %cst_43 : f32 to vector<8x1xf32>
    %231 = arith.divf %229, %230 : vector<8x1xf32>
    %cst_44 = arith.constant 9.99999974E-6 : f32
    %232 = vector.broadcast %cst_44 : f32 to vector<8x1xf32>
    %233 = arith.addf %231, %232 : vector<8x1xf32>
    %234 = math.rsqrt %233 : vector<8x1xf32>
    %235 = vector.broadcast %234 : vector<8x1xf32> to vector<8x32xf32>
    %236 = arith.mulf %220, %235 : vector<8x32xf32>
    %237 = vector.broadcast %223 : vector<1x32xf32> to vector<8x32xf32>
    %238 = arith.mulf %236, %237 : vector<8x32xf32>
    %c0_45 = arith.constant 0 : index
    %c0_46 = arith.constant 0 : index
    %239 = vector.load %arg8[%c0_45, %c0_46] : memref<32x128xf32, #tpu.memory_space<vmem>>, vector<32x128xf32>
    %cst_47 = arith.constant dense<0.000000e+00> : vector<8x128xf32>
    %240 = tpu.matmul %238, %239, %cst_47 {dimension_numbers = #tpu.dot_dimension_numbers<[1], [0], [0], [1], [0, 0, 1, 1], [], []>} : vector<8x32xf32>, vector<32x128xf32>, vector<8x128xf32> -> vector<8x128xf32>
    %241 = vector.extract_strided_slice %240 {offsets = [0, 0], sizes = [8, 64], strides = [1, 1]} : vector<8x128xf32> to vector<8x64xf32>
    %242 = vector.extract_strided_slice %240 {offsets = [0, 64], sizes = [8, 64], strides = [1, 1]} : vector<8x128xf32> to vector<8x64xf32>
    %243 = vector.extract_strided_slice %222 {offsets = [0, 0], sizes = [1, 64], strides = [1, 1]} : vector<4x64xf32> to vector<1x64xf32>
    %244 = vector.broadcast %243 : vector<1x64xf32> to vector<8x64xf32>
    %245 = arith.mulf %244, %241 : vector<8x64xf32>
    %246 = vector.broadcast %224 : vector<1x64xf32> to vector<8x64xf32>
    %247 = arith.addf %246, %245 : vector<8x64xf32>
    %c1_i32_48 = arith.constant 1 : i32
    %248 = tpu.dynamic_rotate %241 by %c1_i32_48 dim 0 : vector<8x64xf32>, i32 -> vector<8x64xf32>
    %c1_i32_49 = arith.constant 1 : i32
    %249 = vector.broadcast %c1_i32_49 : i32 to vector<8x1xi32>
    %250 = arith.cmpi sge, %2, %249 : vector<8x1xi32>
    %cst_50 = arith.constant 0.000000e+00 : f32
    %251 = vector.shape_cast %250 : vector<8x1xi1> to vector<8x1xi1>
    %252 = vector.broadcast %251 : vector<8x1xi1> to vector<8x64xi1>
    %253 = vector.broadcast %cst_50 : f32 to vector<8x64xf32>
    %254 = arith.select %252, %248, %253 : vector<8x64xi1>, vector<8x64xf32>
    %255 = vector.extract_strided_slice %222 {offsets = [1, 0], sizes = [1, 64], strides = [1, 1]} : vector<4x64xf32> to vector<1x64xf32>
    %256 = vector.broadcast %255 : vector<1x64xf32> to vector<8x64xf32>
    %257 = arith.mulf %256, %254 : vector<8x64xf32>
    %258 = arith.addf %247, %257 : vector<8x64xf32>
    %c2_i32_51 = arith.constant 2 : i32
    %259 = tpu.dynamic_rotate %241 by %c2_i32_51 dim 0 : vector<8x64xf32>, i32 -> vector<8x64xf32>
    %c2_i32_52 = arith.constant 2 : i32
    %260 = vector.broadcast %c2_i32_52 : i32 to vector<8x1xi32>
    %261 = arith.cmpi sge, %2, %260 : vector<8x1xi32>
    %cst_53 = arith.constant 0.000000e+00 : f32
    %262 = vector.shape_cast %261 : vector<8x1xi1> to vector<8x1xi1>
    %263 = vector.broadcast %262 : vector<8x1xi1> to vector<8x64xi1>
    %264 = vector.broadcast %cst_53 : f32 to vector<8x64xf32>
    %265 = arith.select %263, %259, %264 : vector<8x64xi1>, vector<8x64xf32>
    %266 = vector.extract_strided_slice %222 {offsets = [2, 0], sizes = [1, 64], strides = [1, 1]} : vector<4x64xf32> to vector<1x64xf32>
    %267 = vector.broadcast %266 : vector<1x64xf32> to vector<8x64xf32>
    %268 = arith.mulf %267, %265 : vector<8x64xf32>
    %269 = arith.addf %258, %268 : vector<8x64xf32>
    %c3_i32_54 = arith.constant 3 : i32
    %270 = tpu.dynamic_rotate %241 by %c3_i32_54 dim 0 : vector<8x64xf32>, i32 -> vector<8x64xf32>
    %c3_i32_55 = arith.constant 3 : i32
    %271 = vector.broadcast %c3_i32_55 : i32 to vector<8x1xi32>
    %272 = arith.cmpi sge, %2, %271 : vector<8x1xi32>
    %cst_56 = arith.constant 0.000000e+00 : f32
    %273 = vector.shape_cast %272 : vector<8x1xi1> to vector<8x1xi1>
    %274 = vector.broadcast %273 : vector<8x1xi1> to vector<8x64xi1>
    %275 = vector.broadcast %cst_56 : f32 to vector<8x64xf32>
    %276 = arith.select %274, %270, %275 : vector<8x64xi1>, vector<8x64xf32>
    %277 = vector.extract_strided_slice %222 {offsets = [3, 0], sizes = [1, 64], strides = [1, 1]} : vector<4x64xf32> to vector<1x64xf32>
    %278 = vector.broadcast %277 : vector<1x64xf32> to vector<8x64xf32>
    %279 = arith.mulf %278, %276 : vector<8x64xf32>
    %280 = arith.addf %269, %279 : vector<8x64xf32>
    %281 = math.absf %280 : vector<8x64xf32>
    %cst_57 = arith.constant 0.000000e+00 : f32
    %282 = vector.broadcast %cst_57 : f32 to vector<8x64xf32>
    %283 = arith.subf %282, %281 : vector<8x64xf32>
    %284 = math.exp %283 : vector<8x64xf32>
    %cst_58 = arith.constant 1.000000e+00 : f32
    %285 = vector.broadcast %cst_58 : f32 to vector<8x64xf32>
    %286 = arith.addf %285, %284 : vector<8x64xf32>
    %287 = tpu.reciprocal %286 {approx = true} : vector<8x64xf32> -> vector<8x64xf32>
    %cst_59 = arith.constant 0.000000e+00 : f32
    %288 = vector.broadcast %cst_59 : f32 to vector<8x64xf32>
    %289 = arith.cmpf oge, %280, %288 : vector<8x64xf32>
    %290 = arith.mulf %284, %287 : vector<8x64xf32>
    %291 = arith.select %289, %287, %290 : vector<8x64xi1>, vector<8x64xf32>
    %292 = arith.mulf %280, %291 : vector<8x64xf32>
    %c0_60 = arith.constant 0 : index
    %c0_61 = arith.constant 0 : index
    %293 = vector.load %arg9[%c0_60, %c0_61] : memref<64x128xf32, #tpu.memory_space<vmem>>, vector<64x128xf32>
    %cst_62 = arith.constant dense<0.000000e+00> : vector<8x128xf32>
    %294 = tpu.matmul %292, %293, %cst_62 {dimension_numbers = #tpu.dot_dimension_numbers<[1], [0], [0], [1], [0, 0, 1, 1], [], []>} : vector<8x64xf32>, vector<64x128xf32>, vector<8x128xf32> -> vector<8x128xf32>
    %295 = vector.broadcast %226 : vector<1x128xf32> to vector<8x128xf32>
    %296 = arith.addf %294, %295 : vector<8x128xf32>
    %297 = vector.extract_strided_slice %296 {offsets = [0, 0], sizes = [8, 64], strides = [1, 1]} : vector<8x128xf32> to vector<8x64xf32>
    %298 = math.absf %297 : vector<8x64xf32>
    %cst_63 = arith.constant 0.000000e+00 : f32
    %299 = vector.broadcast %cst_63 : f32 to vector<8x64xf32>
    %300 = arith.subf %299, %298 : vector<8x64xf32>
    %301 = math.exp %300 : vector<8x64xf32>
    %302 = math.log1p %301 : vector<8x64xf32>
    %cst_64 = arith.constant 0.000000e+00 : f32
    %303 = vector.broadcast %cst_64 : f32 to vector<8x64xf32>
    %304 = arith.maximumf %297, %303 : vector<8x64xf32>
    %305 = arith.addf %302, %304 : vector<8x64xf32>
    %306 = vector.extract_strided_slice %296 {offsets = [0, 64], sizes = [8, 16], strides = [1, 1]} : vector<8x128xf32> to vector<8x16xf32>
    %307 = vector.extract_strided_slice %296 {offsets = [0, 80], sizes = [8, 16], strides = [1, 1]} : vector<8x128xf32> to vector<8x16xf32>
    %c0_65 = arith.constant 0 : index
    %c0_66 = arith.constant 0 : index
    %308 = vector.load %arg10[%c0_65, %c0_66] : memref<16x64xf32, #tpu.memory_space<vmem>>, vector<16x64xf32>
    %309 = vector.shape_cast %305 : vector<8x64xf32> to vector<8x1x64xf32>
    %310 = vector.shape_cast %308 : vector<16x64xf32> to vector<1x16x64xf32>
    %311 = vector.broadcast %309 : vector<8x1x64xf32> to vector<8x16x64xf32>
    %312 = vector.broadcast %310 : vector<1x16x64xf32> to vector<8x16x64xf32>
    %313 = arith.mulf %311, %312 : vector<8x16x64xf32>
    %314 = math.exp %313 : vector<8x16x64xf32>
    %315 = arith.mulf %305, %292 : vector<8x64xf32>
    %316 = vector.shape_cast %315 : vector<8x64xf32> to vector<8x1x64xf32>
    %317 = vector.shape_cast %306 : vector<8x16xf32> to vector<8x16x1xf32>
    %318 = vector.broadcast %316 : vector<8x1x64xf32> to vector<8x16x64xf32>
    %319 = vector.broadcast %317 : vector<8x16x1xf32> to vector<8x16x64xf32>
    %320 = arith.mulf %318, %319 : vector<8x16x64xf32>
    %321 = vector.shape_cast %307 : vector<8x16xf32> to vector<8x16x1xf32>
    %cst_67 = arith.constant 0.000000e+00 : f32
    %322 = vector.broadcast %cst_67 : f32 to vector<16x64xf32>
    %323 = vector.extract_strided_slice %314 {offsets = [0, 0, 0], sizes = [1, 16, 64], strides = [1, 1, 1]} : vector<8x16x64xf32> to vector<1x16x64xf32>
    %324 = vector.shape_cast %323 : vector<1x16x64xf32> to vector<16x64xf32>
    %325 = arith.mulf %324, %322 : vector<16x64xf32>
    %326 = vector.extract_strided_slice %320 {offsets = [0, 0, 0], sizes = [1, 16, 64], strides = [1, 1, 1]} : vector<8x16x64xf32> to vector<1x16x64xf32>
    %327 = vector.shape_cast %326 : vector<1x16x64xf32> to vector<16x64xf32>
    %328 = arith.addf %325, %327 : vector<16x64xf32>
    %329 = vector.extract_strided_slice %321 {offsets = [0, 0, 0], sizes = [1, 16, 1], strides = [1, 1, 1]} : vector<8x16x1xf32> to vector<1x16x1xf32>
    %330 = vector.shape_cast %329 : vector<1x16x1xf32> to vector<16x1xf32>
    %331 = vector.broadcast %330 : vector<16x1xf32> to vector<16x64xf32>
    %332 = arith.mulf %331, %328 : vector<16x64xf32>
    %cst_68 = arith.constant dense<0.000000e+00> : vector<64xf32>
    %333 = vector.multi_reduction <add>, %332, %cst_68 [0] : vector<16x64xf32> to vector<64xf32>
    %334 = vector.shape_cast %333 : vector<64xf32> to vector<1x64xf32>
    %335 = vector.extract_strided_slice %314 {offsets = [1, 0, 0], sizes = [1, 16, 64], strides = [1, 1, 1]} : vector<8x16x64xf32> to vector<1x16x64xf32>
    %336 = vector.shape_cast %335 : vector<1x16x64xf32> to vector<16x64xf32>
    %337 = arith.mulf %336, %328 : vector<16x64xf32>
    %338 = vector.extract_strided_slice %320 {offsets = [1, 0, 0], sizes = [1, 16, 64], strides = [1, 1, 1]} : vector<8x16x64xf32> to vector<1x16x64xf32>
    %339 = vector.shape_cast %338 : vector<1x16x64xf32> to vector<16x64xf32>
    %340 = arith.addf %337, %339 : vector<16x64xf32>
    %341 = vector.extract_strided_slice %321 {offsets = [1, 0, 0], sizes = [1, 16, 1], strides = [1, 1, 1]} : vector<8x16x1xf32> to vector<1x16x1xf32>
    %342 = vector.shape_cast %341 : vector<1x16x1xf32> to vector<16x1xf32>
    %343 = vector.broadcast %342 : vector<16x1xf32> to vector<16x64xf32>
    %344 = arith.mulf %343, %340 : vector<16x64xf32>
    %cst_69 = arith.constant dense<0.000000e+00> : vector<64xf32>
    %345 = vector.multi_reduction <add>, %344, %cst_69 [0] : vector<16x64xf32> to vector<64xf32>
    %346 = vector.shape_cast %345 : vector<64xf32> to vector<1x64xf32>
    %347 = vector.extract_strided_slice %314 {offsets = [2, 0, 0], sizes = [1, 16, 64], strides = [1, 1, 1]} : vector<8x16x64xf32> to vector<1x16x64xf32>
    %348 = vector.shape_cast %347 : vector<1x16x64xf32> to vector<16x64xf32>
    %349 = arith.mulf %348, %340 : vector<16x64xf32>
    %350 = vector.extract_strided_slice %320 {offsets = [2, 0, 0], sizes = [1, 16, 64], strides = [1, 1, 1]} : vector<8x16x64xf32> to vector<1x16x64xf32>
    %351 = vector.shape_cast %350 : vector<1x16x64xf32> to vector<16x64xf32>
    %352 = arith.addf %349, %351 : vector<16x64xf32>
    %353 = vector.extract_strided_slice %321 {offsets = [2, 0, 0], sizes = [1, 16, 1], strides = [1, 1, 1]} : vector<8x16x1xf32> to vector<1x16x1xf32>
    %354 = vector.shape_cast %353 : vector<1x16x1xf32> to vector<16x1xf32>
    %355 = vector.broadcast %354 : vector<16x1xf32> to vector<16x64xf32>
    %356 = arith.mulf %355, %352 : vector<16x64xf32>
    %cst_70 = arith.constant dense<0.000000e+00> : vector<64xf32>
    %357 = vector.multi_reduction <add>, %356, %cst_70 [0] : vector<16x64xf32> to vector<64xf32>
    %358 = vector.shape_cast %357 : vector<64xf32> to vector<1x64xf32>
    %359 = vector.extract_strided_slice %314 {offsets = [3, 0, 0], sizes = [1, 16, 64], strides = [1, 1, 1]} : vector<8x16x64xf32> to vector<1x16x64xf32>
    %360 = vector.shape_cast %359 : vector<1x16x64xf32> to vector<16x64xf32>
    %361 = arith.mulf %360, %352 : vector<16x64xf32>
    %362 = vector.extract_strided_slice %320 {offsets = [3, 0, 0], sizes = [1, 16, 64], strides = [1, 1, 1]} : vector<8x16x64xf32> to vector<1x16x64xf32>
    %363 = vector.shape_cast %362 : vector<1x16x64xf32> to vector<16x64xf32>
    %364 = arith.addf %361, %363 : vector<16x64xf32>
    %365 = vector.extract_strided_slice %321 {offsets = [3, 0, 0], sizes = [1, 16, 1], strides = [1, 1, 1]} : vector<8x16x1xf32> to vector<1x16x1xf32>
    %366 = vector.shape_cast %365 : vector<1x16x1xf32> to vector<16x1xf32>
    %367 = vector.broadcast %366 : vector<16x1xf32> to vector<16x64xf32>
    %368 = arith.mulf %367, %364 : vector<16x64xf32>
    %cst_71 = arith.constant dense<0.000000e+00> : vector<64xf32>
    %369 = vector.multi_reduction <add>, %368, %cst_71 [0] : vector<16x64xf32> to vector<64xf32>
    %370 = vector.shape_cast %369 : vector<64xf32> to vector<1x64xf32>
    %371 = vector.extract_strided_slice %314 {offsets = [4, 0, 0], sizes = [1, 16, 64], strides = [1, 1, 1]} : vector<8x16x64xf32> to vector<1x16x64xf32>
    %372 = vector.shape_cast %371 : vector<1x16x64xf32> to vector<16x64xf32>
    %373 = arith.mulf %372, %364 : vector<16x64xf32>
    %374 = vector.extract_strided_slice %320 {offsets = [4, 0, 0], sizes = [1, 16, 64], strides = [1, 1, 1]} : vector<8x16x64xf32> to vector<1x16x64xf32>
    %375 = vector.shape_cast %374 : vector<1x16x64xf32> to vector<16x64xf32>
    %376 = arith.addf %373, %375 : vector<16x64xf32>
    %377 = vector.extract_strided_slice %321 {offsets = [4, 0, 0], sizes = [1, 16, 1], strides = [1, 1, 1]} : vector<8x16x1xf32> to vector<1x16x1xf32>
    %378 = vector.shape_cast %377 : vector<1x16x1xf32> to vector<16x1xf32>
    %379 = vector.broadcast %378 : vector<16x1xf32> to vector<16x64xf32>
    %380 = arith.mulf %379, %376 : vector<16x64xf32>
    %cst_72 = arith.constant dense<0.000000e+00> : vector<64xf32>
    %381 = vector.multi_reduction <add>, %380, %cst_72 [0] : vector<16x64xf32> to vector<64xf32>
    %382 = vector.shape_cast %381 : vector<64xf32> to vector<1x64xf32>
    %383 = vector.extract_strided_slice %314 {offsets = [5, 0, 0], sizes = [1, 16, 64], strides = [1, 1, 1]} : vector<8x16x64xf32> to vector<1x16x64xf32>
    %384 = vector.shape_cast %383 : vector<1x16x64xf32> to vector<16x64xf32>
    %385 = arith.mulf %384, %376 : vector<16x64xf32>
    %386 = vector.extract_strided_slice %320 {offsets = [5, 0, 0], sizes = [1, 16, 64], strides = [1, 1, 1]} : vector<8x16x64xf32> to vector<1x16x64xf32>
    %387 = vector.shape_cast %386 : vector<1x16x64xf32> to vector<16x64xf32>
    %388 = arith.addf %385, %387 : vector<16x64xf32>
    %389 = vector.extract_strided_slice %321 {offsets = [5, 0, 0], sizes = [1, 16, 1], strides = [1, 1, 1]} : vector<8x16x1xf32> to vector<1x16x1xf32>
    %390 = vector.shape_cast %389 : vector<1x16x1xf32> to vector<16x1xf32>
    %391 = vector.broadcast %390 : vector<16x1xf32> to vector<16x64xf32>
    %392 = arith.mulf %391, %388 : vector<16x64xf32>
    %cst_73 = arith.constant dense<0.000000e+00> : vector<64xf32>
    %393 = vector.multi_reduction <add>, %392, %cst_73 [0] : vector<16x64xf32> to vector<64xf32>
    %394 = vector.shape_cast %393 : vector<64xf32> to vector<1x64xf32>
    %395 = vector.extract_strided_slice %314 {offsets = [6, 0, 0], sizes = [1, 16, 64], strides = [1, 1, 1]} : vector<8x16x64xf32> to vector<1x16x64xf32>
    %396 = vector.shape_cast %395 : vector<1x16x64xf32> to vector<16x64xf32>
    %397 = arith.mulf %396, %388 : vector<16x64xf32>
    %398 = vector.extract_strided_slice %320 {offsets = [6, 0, 0], sizes = [1, 16, 64], strides = [1, 1, 1]} : vector<8x16x64xf32> to vector<1x16x64xf32>
    %399 = vector.shape_cast %398 : vector<1x16x64xf32> to vector<16x64xf32>
    %400 = arith.addf %397, %399 : vector<16x64xf32>
    %401 = vector.extract_strided_slice %321 {offsets = [6, 0, 0], sizes = [1, 16, 1], strides = [1, 1, 1]} : vector<8x16x1xf32> to vector<1x16x1xf32>
    %402 = vector.shape_cast %401 : vector<1x16x1xf32> to vector<16x1xf32>
    %403 = vector.broadcast %402 : vector<16x1xf32> to vector<16x64xf32>
    %404 = arith.mulf %403, %400 : vector<16x64xf32>
    %cst_74 = arith.constant dense<0.000000e+00> : vector<64xf32>
    %405 = vector.multi_reduction <add>, %404, %cst_74 [0] : vector<16x64xf32> to vector<64xf32>
    %406 = vector.shape_cast %405 : vector<64xf32> to vector<1x64xf32>
    %407 = vector.extract_strided_slice %314 {offsets = [7, 0, 0], sizes = [1, 16, 64], strides = [1, 1, 1]} : vector<8x16x64xf32> to vector<1x16x64xf32>
    %408 = vector.shape_cast %407 : vector<1x16x64xf32> to vector<16x64xf32>
    %409 = arith.mulf %408, %400 : vector<16x64xf32>
    %410 = vector.extract_strided_slice %320 {offsets = [7, 0, 0], sizes = [1, 16, 64], strides = [1, 1, 1]} : vector<8x16x64xf32> to vector<1x16x64xf32>
    %411 = vector.shape_cast %410 : vector<1x16x64xf32> to vector<16x64xf32>
    %412 = arith.addf %409, %411 : vector<16x64xf32>
    %413 = vector.extract_strided_slice %321 {offsets = [7, 0, 0], sizes = [1, 16, 1], strides = [1, 1, 1]} : vector<8x16x1xf32> to vector<1x16x1xf32>
    %414 = vector.shape_cast %413 : vector<1x16x1xf32> to vector<16x1xf32>
    %415 = vector.broadcast %414 : vector<16x1xf32> to vector<16x64xf32>
    %416 = arith.mulf %415, %412 : vector<16x64xf32>
    %cst_75 = arith.constant dense<0.000000e+00> : vector<64xf32>
    %417 = vector.multi_reduction <add>, %416, %cst_75 [0] : vector<16x64xf32> to vector<64xf32>
    %418 = vector.shape_cast %417 : vector<64xf32> to vector<1x64xf32>
    %419 = tpu.concatenate %334, %346, %358, %370, %382, %394, %406, %418 in 0 : vector<1x64xf32>, vector<1x64xf32>, vector<1x64xf32>, vector<1x64xf32>, vector<1x64xf32>, vector<1x64xf32>, vector<1x64xf32>, vector<1x64xf32> -> vector<8x64xf32>
    %420 = vector.broadcast %225 : vector<1x64xf32> to vector<8x64xf32>
    %421 = arith.mulf %292, %420 : vector<8x64xf32>
    %422 = arith.addf %419, %421 : vector<8x64xf32>
    %423 = math.absf %242 : vector<8x64xf32>
    %cst_76 = arith.constant 0.000000e+00 : f32
    %424 = vector.broadcast %cst_76 : f32 to vector<8x64xf32>
    %425 = arith.subf %424, %423 : vector<8x64xf32>
    %426 = math.exp %425 : vector<8x64xf32>
    %cst_77 = arith.constant 1.000000e+00 : f32
    %427 = vector.broadcast %cst_77 : f32 to vector<8x64xf32>
    %428 = arith.addf %427, %426 : vector<8x64xf32>
    %429 = tpu.reciprocal %428 {approx = true} : vector<8x64xf32> -> vector<8x64xf32>
    %cst_78 = arith.constant 0.000000e+00 : f32
    %430 = vector.broadcast %cst_78 : f32 to vector<8x64xf32>
    %431 = arith.cmpf oge, %242, %430 : vector<8x64xf32>
    %432 = arith.mulf %426, %429 : vector<8x64xf32>
    %433 = arith.select %431, %429, %432 : vector<8x64xi1>, vector<8x64xf32>
    %434 = arith.mulf %242, %433 : vector<8x64xf32>
    %435 = arith.mulf %422, %434 : vector<8x64xf32>
    %c0_79 = arith.constant 0 : index
    %c0_80 = arith.constant 0 : index
    %436 = vector.load %arg11[%c0_79, %c0_80] : memref<64x32xf32, #tpu.memory_space<vmem>>, vector<64x32xf32>
    %cst_81 = arith.constant dense<0.000000e+00> : vector<8x32xf32>
    %437 = tpu.matmul %435, %436, %cst_81 {dimension_numbers = #tpu.dot_dimension_numbers<[1], [0], [0], [1], [0, 0, 1, 1], [], []>} : vector<8x64xf32>, vector<64x32xf32>, vector<8x32xf32> -> vector<8x32xf32>
    %438 = arith.addf %220, %437 : vector<8x32xf32>
    %c0_82 = arith.constant 0 : index
    %c0_83 = arith.constant 0 : index
    %439 = vector.load %arg12[%c0_82, %c0_83] : memref<2x128xf32, #tpu.memory_space<vmem>>, vector<2x128xf32>
    %440 = vector.extract_strided_slice %439 {offsets = [0, 0], sizes = [1, 32], strides = [1, 1]} : vector<2x128xf32> to vector<1x32xf32>
    %441 = vector.extract_strided_slice %439 {offsets = [1, 0], sizes = [1, 128], strides = [1, 1]} : vector<2x128xf32> to vector<1x128xf32>
    %442 = arith.mulf %438, %438 : vector<8x32xf32>
    %cst_84 = arith.constant dense<0.000000e+00> : vector<8xf32>
    %443 = vector.multi_reduction <add>, %442, %cst_84 [1] : vector<8x32xf32> to vector<8xf32>
    %444 = vector.shape_cast %443 : vector<8xf32> to vector<8x1xf32>
    %cst_85 = arith.constant 3.200000e+01 : f32
    %445 = vector.broadcast %cst_85 : f32 to vector<8x1xf32>
    %446 = arith.divf %444, %445 : vector<8x1xf32>
    %cst_86 = arith.constant 9.99999974E-6 : f32
    %447 = vector.broadcast %cst_86 : f32 to vector<8x1xf32>
    %448 = arith.addf %446, %447 : vector<8x1xf32>
    %449 = math.rsqrt %448 : vector<8x1xf32>
    %450 = vector.broadcast %449 : vector<8x1xf32> to vector<8x32xf32>
    %451 = arith.mulf %438, %450 : vector<8x32xf32>
    %452 = vector.broadcast %440 : vector<1x32xf32> to vector<8x32xf32>
    %453 = arith.mulf %451, %452 : vector<8x32xf32>
    %cst_87 = arith.constant dense<0.000000e+00> : vector<32xf32>
    %454 = vector.multi_reduction <add>, %453, %cst_87 [0] : vector<8x32xf32> to vector<32xf32>
    %455 = vector.shape_cast %454 : vector<32xf32> to vector<1x32xf32>
    %cst_88 = arith.constant 8.000000e+00 : f32
    %456 = vector.broadcast %cst_88 : f32 to vector<1x32xf32>
    %457 = arith.divf %455, %456 : vector<1x32xf32>
    %c0_89 = arith.constant 0 : index
    %c0_90 = arith.constant 0 : index
    %458 = vector.load %arg13[%c0_89, %c0_90] : memref<32x128xf32, #tpu.memory_space<vmem>>, vector<32x128xf32>
    %cst_91 = arith.constant dense<0.000000e+00> : vector<1x128xf32>
    %459 = tpu.matmul %457, %458, %cst_91 {dimension_numbers = #tpu.dot_dimension_numbers<[1], [0], [0], [1], [0, 0, 1, 1], [], []>} : vector<1x32xf32>, vector<32x128xf32>, vector<1x128xf32> -> vector<1x128xf32>
    %460 = arith.addf %459, %441 : vector<1x128xf32>
    %461 = vector.shape_cast %460 : vector<1x128xf32> to vector<1x128xf32>
    %462 = vector.broadcast %461 : vector<1x128xf32> to vector<8x128xf32>
    %c0_92 = arith.constant 0 : index
    %c0_93 = arith.constant 0 : index
    %c0_94 = arith.constant 0 : index
    %463 = vector.load %arg14[%c0_92, %c0_93, %c0_94] : memref<1x8x128xf32, #tpu.memory_space<vmem>>, vector<1x8x128xf32>
    %464 = vector.shape_cast %463 : vector<1x8x128xf32> to vector<8x128xf32>
    %465 = vector.shape_cast %462 : vector<8x128xf32> to vector<1x8x128xf32>
    tpu.vector_store %arg14[%c0_92, %c0_93, %c0_94], %465 {strides = array<i32>} : memref<1x8x128xf32, #tpu.memory_space<vmem>>, vector<1x8x128xf32>,
    return
  }
  func.func @transform_0(%arg0: i32) -> (i32, i32, i32) {
    %c0_i32 = arith.constant 0 : i32
    %c0_i32_0 = arith.constant 0 : i32
    %c0_i32_1 = arith.constant 0 : i32
    return %arg0, %c0_i32, %c0_i32_0 : i32, i32, i32
  }
  func.func @transform_1(%arg0: i32) -> (i32, i32) {
    %c0_i32 = arith.constant 0 : i32
    %c0_i32_0 = arith.constant 0 : i32
    %c0_i32_1 = arith.constant 0 : i32
    return %c0_i32, %c0_i32_0 : i32, i32
  }
  func.func @transform_2(%arg0: i32) -> (i32, i32) {
    %c0_i32 = arith.constant 0 : i32
    %c0_i32_0 = arith.constant 0 : i32
    %c0_i32_1 = arith.constant 0 : i32
    return %c0_i32, %c0_i32_0 : i32, i32
  }
  func.func @transform_3(%arg0: i32) -> (i32, i32) {
    %c0_i32 = arith.constant 0 : i32
    %c0_i32_0 = arith.constant 0 : i32
    %c0_i32_1 = arith.constant 0 : i32
    return %c0_i32, %c0_i32_0 : i32, i32
  }
  func.func @transform_4(%arg0: i32) -> (i32, i32) {
    %c0_i32 = arith.constant 0 : i32
    %c0_i32_0 = arith.constant 0 : i32
    %c0_i32_1 = arith.constant 0 : i32
    return %c0_i32, %c0_i32_0 : i32, i32
  }
  func.func @transform_5(%arg0: i32) -> (i32, i32) {
    %c0_i32 = arith.constant 0 : i32
    %c0_i32_0 = arith.constant 0 : i32
    %c0_i32_1 = arith.constant 0 : i32
    return %c0_i32, %c0_i32_0 : i32, i32
  }
  func.func @transform_6(%arg0: i32) -> (i32, i32) {
    %c0_i32 = arith.constant 0 : i32
    %c0_i32_0 = arith.constant 0 : i32
    %c0_i32_1 = arith.constant 0 : i32
    return %c0_i32, %c0_i32_0 : i32, i32
  }
  func.func @transform_7(%arg0: i32) -> (i32, i32) {
    %c0_i32 = arith.constant 0 : i32
    %c0_i32_0 = arith.constant 0 : i32
    %c0_i32_1 = arith.constant 0 : i32
    return %c0_i32, %c0_i32_0 : i32, i32
  }
  func.func @transform_8(%arg0: i32) -> (i32, i32) {
    %c0_i32 = arith.constant 0 : i32
    %c0_i32_0 = arith.constant 0 : i32
    %c0_i32_1 = arith.constant 0 : i32
    return %c0_i32, %c0_i32_0 : i32, i32
  }
  func.func @transform_9(%arg0: i32) -> (i32, i32) {
    %c0_i32 = arith.constant 0 : i32
    %c0_i32_0 = arith.constant 0 : i32
    %c0_i32_1 = arith.constant 0 : i32
    return %c0_i32, %c0_i32_0 : i32, i32
  }
  func.func @transform_10(%arg0: i32) -> (i32, i32) {
    %c0_i32 = arith.constant 0 : i32
    %c0_i32_0 = arith.constant 0 : i32
    %c0_i32_1 = arith.constant 0 : i32
    return %c0_i32, %c0_i32_0 : i32, i32
  }
  func.func @transform_11(%arg0: i32) -> (i32, i32) {
    %c0_i32 = arith.constant 0 : i32
    %c0_i32_0 = arith.constant 0 : i32
    %c0_i32_1 = arith.constant 0 : i32
    return %c0_i32, %c0_i32_0 : i32, i32
  }
  func.func @transform_12(%arg0: i32) -> (i32, i32) {
    %c0_i32 = arith.constant 0 : i32
    %c0_i32_0 = arith.constant 0 : i32
    %c0_i32_1 = arith.constant 0 : i32
    return %c0_i32, %c0_i32_0 : i32, i32
  }
  func.func @transform_13(%arg0: i32) -> (i32, i32, i32) {
    %c0_i32 = arith.constant 0 : i32
    %c0_i32_0 = arith.constant 0 : i32
    %c0_i32_1 = arith.constant 0 : i32
    return %arg0, %c0_i32, %c0_i32_0 : i32, i32, i32
  }
}

</mosaic_0001>

<bundles_post_ra>
// kernel: forward.1
= control target key start
LH: loop header
LB: loop body
LE: loop exit
PB: predicated region body
PF: predicated region fallthrough
CT: control target
= control target key end

     0   :  { %s2795_s25 = smov 0   ;;  %s3456_s0 = inlined_call_operand.vmem [shape: f32[2,8,32], index: 0, kind: input, shape index: {}]   ;;  %s3457_s1 = inlined_call_operand.vmem [shape: f32[8,128], index: 1, kind: input, shape index: {}]   ;;  %s3458_s2 = inlined_call_operand.vmem [shape: f32[32,128], index: 2, kind: input, shape index: {}]   ;;  %s3459_s3 = inlined_call_operand.vmem [shape: f32[64,128], index: 3, kind: input, shape index: {}]   ;;  %s3460_s4 = inlined_call_operand.vmem [shape: f32[16,64], index: 4, kind: input, shape index: {}]   ;;  %s3461_s5 = inlined_call_operand.vmem [shape: f32[64,32], index: 5, kind: input, shape index: {}]   ;;  %s3462_s6 = inlined_call_operand.vmem [shape: f32[8,128], index: 6, kind: input, shape index: {}]   ;;  %s3463_s7 = inlined_call_operand.vmem [shape: f32[32,128], index: 7, kind: input, shape index: {}]   ;;  %s3464_s8 = inlined_call_operand.vmem [shape: f32[64,128], index: 8, kind: input, shape index: {}]   ;;  %s3465_s9 = inlined_call_operand.vmem [shape: f32[16,64], index: 9, kind: input, shape index: {}]   ;;  %s3466_s10 = inlined_call_operand.vmem [shape: f32[64,32], index: 10, kind: input, shape index: {}]   ;;  %s3467_s11 = inlined_call_operand.vmem [shape: f32[2,128], index: 11, kind: input, shape index: {}]   ;;  %s3468_s12 = inlined_call_operand.vmem [shape: f32[32,128], index: 12, kind: input, shape index: {}]   ;;  %s3469_s13 = inlined_call_operand.vmem [shape: f32[2,8,128], index: 13, kind: output, shape index: {}]  }
   0x1 LB: > { %s2363_s26 = sadd.s32 4294967295, %s2718_s25   ;;  %p2367_p0 = scmp.ge.s32.totalorder %s2718_s25, 1  ;;  %s2718_s25 = sphi %s2795_s25, %s23_s25  }
   0x2   : > { %p386_p1 = scmp.lt.s32.totalorder %s2718_s25, 3 }
   0x4   : > { %p387_p2 = pnand %p2367_p0, %p386_p1 }
   0x5   : > { %p428_p3 = scmp.lt.s32.totalorder (!%p387_p2), %s2363_s26, 1  ;;  %vm441_vm0 = vcmask (!%p387_p2), 261120   ;;  %v455_v3 = vld [vmem:[%s3458_s2] sm:$0xff] (!%p387_p2)  ;;  %v456_v4 = vld [vmem:[%s3458_s2 + $0x8] sm:$0xff] (!%p387_p2)  ;;  %v457_v5 = vld [vmem:[%s3458_s2 + $0x10] sm:$0xff] (!%p387_p2)  ;;  %v2720_v6 = vmov (!%p387_p2), 0.0|0.0   ;;  %v437_v13 = vlaneseq (!%p387_p2) }
   0x6   : > { %390 = sbr.rel (%p387_p2) target bundleno = 2547 (0x9f3), region = 72  ;;  %2539 = vmatprep.subr.bf16.mxu0 (!%p387_p2), %v2720_v6  ;;  %v2540_v7 = vpack.c.bf16 (!%p387_p2), %v456_v4, %v455_v3  ;;  %v458_v8 = vld [vmem:[%s3458_s2 + $0x18] sm:$0xff] (!%p387_p2)  ;;  %vm2721_vm1 = vmmov (!%p387_p2), 0   ;;  %v2722_v9 = vmov (!%p387_p2), 0.0   ;;  %2545 = vmatprep.subr.bf16.mxu1 (!%p387_p2), %v2720_v6  ;;  %v2844_v17 = vld [vmem:[%s3457_s1] sm:$0xff] (!%p387_p2)  ;;  %v586_v23 = vld [vmem:[%s3459_s3 + $0x8] sm:$0xff] (!%p387_p2) }
   0x7   : > { %2438 = vmatprep.mubr.msk.f32.mxu0 (!%p387_p2), %vm2721_vm1, %v2722_v9  ;;  %2457 = vmatprep.mubr.msk.f32.mxu1 (!%p387_p2), %vm2721_vm1, %v2722_v9  ;;  %v2543_v10 = vpack.c.bf16 (!%p387_p2), %v458_v8, %v457_v5  ;;  %v2836_v15 = vshrl.u32 (!%p387_p2), %v437_v13, 7  ;;  %v585_v22 = vld [vmem:[%s3459_s3] sm:$0xff] (!%p387_p2)  ;;  %v587_v24 = vld [vmem:[%s3459_s3 + $0x10] sm:$0xff] (!%p387_p2)  ;;  %v588_v26 = vld [vmem:[%s3459_s3 + $0x18] sm:$0xff] (!%p387_p2)  ;;  %vm597_vm6 = vcmask (!%p387_p2), 523264   ;;  %s2723_s29 = smov (!%p387_p2), 64  }
   0x8   : > { %2541 = vmatpush3.bf16.msra.mxu0 (!%p387_p2), %v2540_v7  ;;  %v2546_v25 = vpack.c.bf16 (!%p387_p2), %v586_v23, %v585_v22  ;;  %v2549_v27 = vpack.c.bf16 (!%p387_p2), %v588_v26, %v587_v24  ;;  %v589_v28 = vld [vmem:[%s3459_s3 + $0x20] sm:$0xff] (!%p387_p2)  ;;  %v590_v29 = vld [vmem:[%s3459_s3 + $0x28] sm:$0xff] (!%p387_p2)  ;;  %v591_v31 = vld [vmem:[%s3459_s3 + $0x30] sm:$0xff] (!%p387_p2)  ;;  %vm1213_vm9 = vcmask (!%p387_p2), 1040384   ;;  %vm1215_vm10 = vcmask (!%p387_p2), 1041408  }
   0x9   : > { %2542 = vmatprep.subr.bf16.mxu0 (!%p387_p2), %v2720_v6  ;;  %v2839_v16 = vsub.s32 (!%p387_p2), 4, %v2836_v15  ;;  %v2552_v30 = vpack.c.bf16 (!%p387_p2), %v590_v29, %v589_v28  ;;  %v592_v32 = vld [vmem:[%s3459_s3 + $0x38] sm:$0xff] (!%p387_p2)  ;;  %v2881_v34 = vsub.s32 (!%p387_p2), 0, %v2836_v15  ;;  %v2884_v35 = vsub.s32 (!%p387_p2), 5, %v2836_v15 }
   0xa   : > { %2547 = vmatpush3.bf16.msra.mxu1 (!%p387_p2), %v2546_v25  ;;  %v2555_v33 = vpack.c.bf16 (!%p387_p2), %v592_v32, %v591_v31  ;;  %v2887_v36 = vsub.s32 (!%p387_p2), 1, %v2836_v15  ;;  %v2892_v38 = vsub.s32 (!%p387_p2), 2, %v2836_v15  ;;  %vm543_vm2 = vcmp.ge.s32.totalorder (!%p387_p2), %v2836_v15, 1 }
   0xb   : > { %v453_v18 = vrot.slane (!%p387_p2), %v2844_v17, %v2839_v16  ;;  %2548 = vmatprep.subr.bf16.mxu1 (!%p387_p2), %v2720_v6  ;;  %v535_v37 = vrot.slane (!%p387_p2), %v2844_v17, %v2881_v34  ;;  %v540_v39 = vrot.slane (!%p387_p2), %v2844_v17, %v2884_v35  ;;  %vm554_vm3 = vcmp.ge.s32.totalorder (!%p387_p2), %v2836_v15, 2 }
   0xc   : > { %2544 = vmatpush3.bf16.msra.mxu0 (!%p387_p2), %v2543_v10  ;;  %v550_v41 = vrot.slane (!%p387_p2), %v2844_v17, %v2887_v36  ;;  %v2903_v42 = vsub.s32 (!%p387_p2), 3, %v2836_v15  ;;  %v561_v48 = vrot.slane (!%p387_p2), %v2844_v17, %v2892_v38  ;;  %vm565_vm4 = vcmp.ge.s32.totalorder (!%p387_p2), %v2836_v15, 3 }
   0xd   : > { %s3471_s26 = smov (!%p428_p3, %s2363_s26), 1  ;;  %2557 = vmatprep.subr.bf16.mxu0 %v2720_v6  ;;  %v2927_v7 = vsub.s32 7, %v2836_v15  ;;  %v2943_v22 = vsub.s32 6, %v2836_v15  ;;  %vm1217_vm11 = vcmask 1042432   ;;  %vm1219_vm12 = vcmask 1043456  }
   0xe   : > { %s2368_s27 = sshll.u32 %s3471_s26, 3  ;;  %2550 = vmatpush3.bf16.msra.mxu1 %v2549_v27  ;;  %v572_v53 = vrot.slane %v2844_v17, %v2903_v42  ;;  %vm1221_vm13 = vcmask 1044480   ;;  %vm1223_vm14 = vcmask 1045504   ;;  %vm1225_vm15 = vcmask 1046528  }
   0xf   : > { %s431_s30 = scalar_lea.vmem %s3456_s0, %s2368_s27  ;;  %2551 = vmatprep.subr.bf16.mxu1 %v2720_v6  ;;  %v596_v8 = vrot.slane %v2844_v17, %v2927_v7  ;;  %s435_s23 = scalar_lea.vmem %s3469_s13, %s2368_s27 }
  0x10   : > { %v2811_v0 = vld [vmem:[%s431_s30] sm:$0xff] }
  0x11   : > { %v440_v1 = vmul.f32 %v2811_v0, %v2811_v0 }
  0x12   : > { %2553 = vmatpush3.bf16.msra.mxu1 %v2552_v30 }
  0x13   : > { %v442_v2 = vsel %vm441_vm0, %v440_v1, 0.0  ;;  %2554 = vmatprep.subr.bf16.mxu1 %v2720_v6 }
  0x14   : > { %443 = vadd.xlane.f32.xlu0 %v442_v2 }
  0x16   : > { %2556 = vmatpush3.bf16.msra.mxu1 %v2555_v33 }
  0x17   : > { %2569 = vmatprep.subr.bf16.mxu1 %v2720_v6 }
  0xa1   : > { %v444_v11 = vpop.xlane.xlu0 %443 }
  0xa2   : > { %v446_v12 = vmul.f32 0.03125, %v444_v11 }
  0xa4   : > { %v447_v14 = vadd.f32 1e-05, %v446_v12 }
  0xa6   : > { %2618 = vrsqrt.f32 %v447_v14 }
  0xb0   : > { %v2619_v19 = vpop.eup %2618 }
  0xb1   : > { %v449_v20 = vmul.f32 %v2619_v19, %v2811_v0 }
  0xb3   : > { %v454_v21 = vmul.f32 %v453_v18, %v449_v20 }
  0xb5   : > { %2439 = vmatmul.mubr.msk.f32.vlgmr.msra.gmra.mrb[0].mxu0 %vm441_vm0, %v454_v21 }
  0xb6   : > { %2476 = vmatprep.mubr.msk.f32.mxu0 %vm2721_vm1, %v2722_v9 }
 0x188   : > { %v2896_v40 = vpop.f32.mrb[0].mxu0 }
 0x189   : > { %v536_v43 = vmul.f32 %v535_v37, %v2896_v40  ;;  %v542_v44 = vrot.slane %v2896_v40, 7  ;;  %v553_v45 = vrot.slane %v2896_v40, 6  ;;  %v564_v46 = vrot.slane %v2896_v40, 5  ;;  %v2440_v47 = vpop.f32.mrb[1].mxu0 }
 0x18a   : > { %v1233_v14 = vand.u32 2147483647, %v2896_v40  ;;  %vm1239_vm7 = vcmp.ge.f32.partialorder %v2896_v40, 0.0 }
 0x18b   : > { %v541_v49 = vadd.f32 %v540_v39, %v536_v43  ;;  %v546_v50 = vsel %vm543_vm2, %v542_v44, 0.0  ;;  %v557_v51 = vsel %vm554_vm3, %v553_v45, 0.0  ;;  %v568_v54 = vsel %vm565_vm4, %v564_v46, 0.0  ;;  %v1248_v45 = vld [vmem:[%s3461_s5] sm:$0xff]  ;;  %v1250_v46 = vld [vmem:[%s3461_s5 + $0x10] sm:$0xff] }
 0x18c   : > { %v551_v52 = vmul.f32 %v550_v41, %v546_v50  ;;  %v562_v56 = vmul.f32 %v561_v48, %v557_v51  ;;  %v573_v58 = vmul.f32 %v572_v53, %v568_v54  ;;  %v1234_v20 = vsub.f32 0.0, %v1233_v14  ;;  %v1251_v48 = vld [vmem:[%s3461_s5 + $0x18] sm:$0xff]  ;;  %v1252_v51 = vld [vmem:[%s3461_s5 + $0x20] sm:$0xff] }
 0x18d   : > { %v2561_v50 = vpack.c.bf16 %v1251_v48, %v1250_v46 }
 0x18e   : > { %v552_v55 = vadd.f32 %v551_v52, %v541_v49  ;;  %v1235_v23 = vmul.f32 1.442695, %v1234_v20  ;;  %v1253_v52 = vld [vmem:[%s3461_s5 + $0x28] sm:$0xff] }
 0x190   : > { %v563_v57 = vadd.f32 %v562_v56, %v552_v55  ;;  %v2724_v55 = vmov 1966171168  }
 0x191   : > { %v691_v56 = vunpack.c.l.s4 %v2724_v55 }
 0x192   : > { %v574_v59 = vadd.f32 %v573_v58, %v563_v57  ;;  %v2564_v58 = vpack.c.bf16 %v1253_v52, %v1252_v51 }
 0x194   : > { %v575_v60 = vand.u32 2147483647, %v574_v59  ;;  %vm581_vm5 = vcmp.ge.f32.partialorder %v574_v59, 0.0 }
 0x196   : > { %v576_v61 = vsub.f32 0.0, %v575_v60  ;;  %v1254_v60 = vld [vmem:[%s3461_s5 + $0x30] sm:$0xff] }
 0x198   : > { %v577_v62 = vmul.f32 1.442695, %v576_v61  ;;  %v1255_v61 = vld [vmem:[%s3461_s5 + $0x38] sm:$0xff] }
 0x19a   : > { %2620 = vpow2.f32 %v577_v62 }
 0x1a4   : > { %v2621_v63 = vpop.eup %2620 }
 0x1a5   : > { %v579_v1 = vadd.f32 1.0, %v2621_v63 }
 0x1a7   : > { %2622 = vrcp.f32 %v579_v1  ;;  %v2567_v1 = vpack.c.bf16 %v1255_v61, %v1254_v60 }
 0x1a8   : > { %2624 = vpow2.f32 %v1235_v23  ;;  %v3003_v23 = vld [vmem:[%s3460_s4 + $0x8] sm:$0xff] }
 0x1b1   : > { %v2623_v2 = vpop.eup %2622 }
 0x1b2   : > { %v582_v3 = vmul.f32 %v2623_v2, %v2621_v63  ;;  %v2625_v27 = vpop.eup %2624  ;;  %v692_v63 = vunpack.c.0.s8 %v691_v56 }
 0x1b3   : > { %v1237_v29 = vadd.f32 1.0, %v2625_v27 }
 0x1b4   : > { %v583_v4 = vsel %vm581_vm5, %v2623_v2, %v582_v3 }
 0x1b5   : > { %v2920_v5 = vmul.f32 %v583_v4, %v574_v59  ;;  %2626 = vrcp.f32 %v1237_v29  ;;  %v2986_v4 = vsub.s32 %v692_v63, %v2836_v15 }
 0x1b7   : > { %2458 = vmatmul.mubr.msk.f32.vlgmr.msra.gmra.mrb[0].mxu1 %vm597_vm6, %v2920_v5 }
 0x1b8   : > { %2487 = vmatprep.mubr.msk.f32.mxu1 %vm2721_vm1, %v2722_v9 }
 0x1bf   : > { %v2627_v30 = vpop.eup %2626 }
 0x1c0   : > { %v1240_v32 = vmul.f32 %v2627_v30, %v2625_v27 }
 0x1c2   : > { %v1241_v37 = vsel %vm1239_vm7, %v2627_v30, %v1240_v32 }
 0x1c3   : > { %v1242_v41 = vmul.f32 %v1241_v37, %v2896_v40  ;;  %v1249_v40 = vld [vmem:[%s3461_s5 + $0x8] sm:$0xff] }
 0x1c4   : > { %v2558_v47 = vpack.c.bf16 %v1249_v40, %v1248_v45 }
 0x1c6   : > { %2559 = vmatpush3.bf16.msra.mxu0 %v2558_v47 }
 0x1c7   : > { %2560 = vmatprep.subr.bf16.mxu0 %v2720_v6 }
 0x1ca   : > { %2562 = vmatpush3.bf16.msra.mxu0 %v2561_v50 }
 0x1cb   : > { %2563 = vmatprep.subr.bf16.mxu0 %v2720_v6 }
 0x1ce   : > { %2565 = vmatpush3.bf16.msra.mxu0 %v2564_v58 }
 0x1cf   : > { %2566 = vmatprep.subr.bf16.mxu0 %v2720_v6 }
 0x1d2   : > { %2568 = vmatpush3.bf16.msra.mxu0 %v2567_v1 }
 0x1d3   : > { %2575 = vmatprep.subr.bf16.mxu0 %v2720_v6 }
 0x28a   : > { %v667_v10 = vpop.f32.mrb[0].mxu1 }
 0x28b   : > { %v2931_v11 = vadd.f32 %v667_v10, %v596_v8  ;;  %v2459_v12 = vpop.f32.mrb[1].mxu1 }
 0x28d   : > { %v880_v13 = vrot.slane %v2931_v11, %v2881_v34  ;;  %v892_v18 = vrot.slane %v2931_v11, %v2887_v36  ;;  %v928_v19 = vrot.slane %v2931_v11, %v2839_v16  ;;  %v940_v21 = vrot.slane %v2931_v11, %v2884_v35 }
 0x28e   : > { %v904_v24 = vrot.slane %v2931_v11, %v2892_v38  ;;  %v952_v25 = vrot.slane %v2931_v11, %v2943_v22  ;;  %v916_v26 = vrot.slane %v2931_v11, %v2903_v42  ;;  %v964_v28 = vrot.slane %v2931_v11, %v2927_v7 }
 0x28f   : > { %887 = vbcast.lane.b32.xlu1 %v880_v13, 328  ;;  %883 = vbcast.lane.b32.xlu0 %v880_v13, 320  ;;  %v671_v31 = vand.u32 2147483647, %v2931_v11  ;;  %v684_v3 = vmax.f32 %v2931_v11, 0.0 }
 0x291   : > { %v672_v33 = vsub.f32 0.0, %v671_v31 }
 0x293   : > { %895 = vbcast.lane.b32.xlu1 %v892_v18, 320  ;;  %931 = vbcast.lane.b32.xlu0 %v928_v19, 320  ;;  %v673_v39 = vmul.f32 1.442695, %v672_v33 }
 0x295   : > { %2628 = vpow2.f32 %v673_v39 }
 0x297   : > { %899 = vbcast.lane.b32.xlu1 %v892_v18, 328  ;;  %943 = vbcast.lane.b32.xlu0 %v940_v21, 320 }
 0x29b   : > { %907 = vbcast.lane.b32.xlu1 %v904_v24, 320  ;;  %955 = vbcast.lane.b32.xlu0 %v952_v25, 320 }
 0x29f   : > { %911 = vbcast.lane.b32.xlu1 %v904_v24, 328  ;;  %1031 = vbcast.lane.b32.xlu0 %v880_v13, 336  ;;  %v2629_v43 = vpop.eup %2628 }
 0x2a0   : > { %v675_v44 = vadd.f32 1.0, %v2629_v43  ;;  %v678_v49 = vmul.f32 -0.5, %v2629_v43  ;;  %v681_v57 = vand.u32 2147483647, %v2629_v43 }
 0x2a2   : > { %2630 = vlog2.f32 %v675_v44  ;;  %v679_v54 = vadd.f32 1.0, %v678_v49  ;;  %vm682_vm8 = vcmp.lt.f32.partialorder %v681_v57, 0.0004427343 }
 0x2a3   : > { %919 = vbcast.lane.b32.xlu1 %v916_v26, 320  ;;  %1039 = vbcast.lane.b32.xlu0 %v892_v18, 336 }
 0x2a4   : > { %v680_v62 = vmul.f32 %v2629_v43, %v679_v54 }
 0x2a7   : > { %923 = vbcast.lane.b32.xlu1 %v916_v26, 328  ;;  %1047 = vbcast.lane.b32.xlu0 %v904_v24, 336 }
 0x2ab   : > { %935 = vbcast.lane.b32.xlu1 %v928_v19, 328  ;;  %967 = vbcast.lane.b32.xlu0 %v964_v28, 320 }
 0x2ac   : > { %v2631_v53 = vpop.eup %2630 }
 0x2ad   : > { %v677_v59 = vmul.f32 0.6931472, %v2631_v53 }
 0x2af   : > { %947 = vbcast.lane.b32.xlu1 %v940_v21, 328  ;;  %1055 = vbcast.lane.b32.xlu0 %v916_v26, 336  ;;  %v683_v2 = vsel %vm682_vm8, %v680_v62, %v677_v59 }
 0x2b0   : > { %v685_v8 = vadd.f32 %v684_v3, %v683_v2 }
 0x2b2   : > { %v696_v10 = vrot.slane %v685_v8, %v2986_v4 }
 0x2b3   : > { %959 = vbcast.lane.b32.xlu1 %v952_v25, 328  ;;  %1063 = vbcast.lane.b32.xlu0 %v928_v19, 336 }
 0x2b4   : > { %v712_v12 = vrot.slane %v696_v10, %v2986_v4 }
 0x2b6   : > { %v741_v14 = vrot.slane %v712_v12, %v2881_v34 }
 0x2b7   : > { %1035 = vbcast.lane.b32.xlu1 %v880_v13, 344  ;;  %1071 = vbcast.lane.b32.xlu0 %v940_v21, 336  ;;  %v704_v13 = vcombine.high %v696_v10, %v696_v10 }
 0x2b8   : > { %v779_v27 = vmul.f32 %v741_v14, %v3003_v23 }
 0x2b9   : > { %v726_v11 = vrot.slane %v704_v13, %v2986_v4 }
 0x2ba   : > { %v796_v33 = vmul.f32 1.442695, %v779_v27 }
 0x2bb   : > { %1043 = vbcast.lane.b32.xlu1 %v892_v18, 344  ;;  %1079 = vbcast.lane.b32.xlu0 %v952_v25, 336  ;;  %v2995_v18 = vld [vmem:[%s3460_s4] sm:$0xff]  ;;  %v736_v44 = vcombine.high %v726_v11, %v726_v11 }
 0x2bd   : > { %v753_v52 = vrot.slane %v736_v44, %v2881_v34 }
 0x2bf   : > { %1051 = vbcast.lane.b32.xlu1 %v904_v24, 344  ;;  %1087 = vbcast.lane.b32.xlu0 %v964_v28, 336  ;;  %v3006_v24 = vmul.f32 %v685_v8, %v2920_v5  ;;  %v784_v62 = vmul.f32 %v753_v52, %v2995_v18 }
 0x2c1   : > { %v835_v30 = vrot.slane %v3006_v24, %v2986_v4 }
 0x2c3   : > { %971 = vbcast.lane.b32.xlu1 %v964_v28, 328  ;;  %1244 = vrot.lane.b32.xlu0 %v1242_v41, %s2723_s29  ;;  %v689_v41 = vcombine.high %v685_v8, %v685_v8  ;;  %v851_v43 = vrot.slane %v835_v30, %v2986_v4  ;;  %v843_v50 = vcombine.high %v835_v30, %v835_v30 }
 0x2c5   : > { %v703_v48 = vrot.slane %v689_v41, %v2986_v4  ;;  %v976_v49 = vrot.slane %v851_v43, %v2881_v34  ;;  %v865_v58 = vrot.slane %v843_v50, %v2986_v4 }
 0x2c7   : > { %1059 = vbcast.lane.b32.xlu1 %v916_v26, 344  ;;  %v3024_v57 = vrot.slane %v703_v48, %v2986_v4  ;;  %v705_v3 = vcombine.high %v703_v48, %v703_v48  ;;  %v980_v10 = vrot.slane %v865_v58, %v2881_v34 }
 0x2c9   : > { %v757_v2 = vrot.slane %v3024_v57, %v2881_v34 }
 0x2cb   : > { %1067 = vbcast.lane.b32.xlu1 %v928_v19, 344  ;;  %v778_v19 = vmul.f32 %v741_v14, %v2995_v18 }
 0x2cd   : > { %v794_v20 = vmul.f32 1.442695, %v778_v19 }
 0x2cf   : > { %1075 = vbcast.lane.b32.xlu1 %v940_v21, 344  ;;  %v745_v21 = vrot.slane %v726_v11, %v2881_v34  ;;  %2632 = vpow2.f32 %v794_v20  ;;  %v806_v11 = vmul.f32 1.442695, %v784_v62  ;;  %v873_v20 = vcombine.high %v851_v43, %v851_v43 }
 0x2d0   : > { %2634 = vpow2.f32 %v796_v33  ;;  %v3042_v33 = vrot.slane %v705_v3, %v2986_v4 }
 0x2d1   : > { %v780_v29 = vmul.f32 %v745_v21, %v2995_v18  ;;  %v781_v46 = vmul.f32 %v745_v21, %v3003_v23 }
 0x2d3   : > { %1083 = vbcast.lane.b32.xlu1 %v952_v25, 344  ;;  %v798_v39 = vmul.f32 1.442695, %v780_v29  ;;  %v800_v55 = vmul.f32 1.442695, %v781_v46  ;;  %v786_v29 = vmul.f32 %v757_v2, %v2995_v18  ;;  %v761_v46 = vrot.slane %v3042_v33, %v2881_v34 }
 0x2d5   : > { %2636 = vpow2.f32 %v798_v39  ;;  %v810_v44 = vmul.f32 1.442695, %v786_v29 }
 0x2d6   : > { %2638 = vpow2.f32 %v800_v55  ;;  %v828_v55 = vcombine.high %v3006_v24, %v3006_v24 }
 0x2d7   : > { %1091 = vbcast.lane.b32.xlu1 %v964_v28, 344  ;;  %v734_v28 = vcombine.high %v712_v12, %v712_v12 }
 0x2d8   : > { %v842_v24 = vrot.slane %v828_v55, %v2986_v4 }
 0x2d9   : > { %v749_v37 = vrot.slane %v734_v28, %v2881_v34  ;;  %v2633_v51 = vpop.eup %2632  ;;  %v785_v28 = vmul.f32 %v753_v52, %v3003_v23 }
 0x2da   : > { %v1093_v60 = vmul.f32 0.0, %v2633_v51  ;;  %v2635_v8 = vpop.eup %2634  ;;  %v787_v51 = vmul.f32 %v757_v2, %v3003_v23  ;;  %v3069_v29 = vrot.slane %v842_v24, %v2986_v4 }
 0x2db   : > { %v782_v47 = vmul.f32 %v749_v37, %v2995_v18  ;;  %v783_v61 = vmul.f32 %v749_v37, %v3003_v23  ;;  %v1094_v30 = vmul.f32 0.0, %v2635_v8  ;;  %v808_v41 = vmul.f32 1.442695, %v785_v28 }
 0x2dc   : > { %v812_v2 = vmul.f32 1.442695, %v787_v51  ;;  %v844_v51 = vcombine.high %v842_v24, %v842_v24 }
 0x2dd   : > { %v802_v56 = vmul.f32 1.442695, %v782_v47  ;;  %v804_v12 = vmul.f32 1.442695, %v783_v61 }
 0x2df   : > { %2640 = vpow2.f32 %v802_v56  ;;  %v2637_v13 = vpop.eup %2636 }
 0x2e0   : > { %2642 = vpow2.f32 %v804_v12  ;;  %v2639_v47 = vpop.eup %2638 }
 0x2e1   : > { %2644 = vpow2.f32 %v806_v11 }
 0x2e2   : > { %2646 = vpow2.f32 %v808_v41 }
 0x2e3   : > { %2648 = vpow2.f32 %v810_v44  ;;  %v737_v44 = vcombine.high %v3042_v33, %v3042_v33  ;;  %v3084_v33 = vrot.slane %v844_v51, %v2986_v4 }
 0x2e4   : > { %2650 = vpow2.f32 %v812_v2 }
 0x2e9   : > { %v2641_v52 = vpop.eup %2640 }
 0x2ea   : > { %v2643_v8 = vpop.eup %2642 }
 0x301   : > { %v888_v25 = vpop.permute.xlu1 %887  ;;  %v884_v26 = vpop.permute.xlu0 %883 }
 0x302   : > { %v1013_v53 = vmul.f32 %v976_v49, %v884_v26  ;;  %v1014_v14 = vmul.f32 %v976_v49, %v888_v25  ;;  %v984_v25 = vrot.slane %v873_v20, %v2881_v34  ;;  %v875_v49 = vcombine.high %v865_v58, %v865_v58 }
 0x304   : > { %v3031_v1 = vadd.f32 %v1093_v60, %v1013_v53  ;;  %v3044_v37 = vadd.f32 %v1094_v30, %v1014_v14  ;;  %v788_v60 = vmul.f32 %v761_v46, %v2995_v18  ;;  %v988_v58 = vrot.slane %v875_v49, %v2881_v34  ;;  %v2645_v14 = vpop.eup %2644 }
 0x305   : > { %v896_v31 = vpop.permute.xlu1 %895  ;;  %v3012_v32 = vpop.permute.xlu0 %931  ;;  %v992_v49 = vrot.slane %v3069_v29, %v2881_v34 }
 0x306   : > { %v1015_v19 = vmul.f32 %v980_v10, %v896_v31  ;;  %v1108_v27 = vmul.f32 %v2637_v13, %v3031_v1  ;;  %v1109_v53 = vmul.f32 %v2639_v47, %v3044_v37  ;;  %v814_v11 = vmul.f32 1.442695, %v788_v60  ;;  %v2647_v41 = vpop.eup %2646 }
 0x307   : > { %v769_v60 = vrot.slane %v737_v44, %v2881_v34 }
 0x308   : > { %v3047_v31 = vadd.f32 %v1108_v27, %v1015_v19  ;;  %2652 = vpow2.f32 %v814_v11 }
 0x309   : > { %v900_v45 = vpop.permute.xlu1 %899  ;;  %v3016_v40 = vpop.permute.xlu0 %943 }
 0x30a   : > { %v1016_v43 = vmul.f32 %v980_v10, %v900_v45  ;;  %v1123_v56 = vmul.f32 %v2641_v52, %v3047_v31 }
 0x30c   : > { %v1111_v61 = vadd.f32 %v1109_v53, %v1016_v43 }
 0x30d   : > { %v908_v54 = vpop.permute.xlu1 %907  ;;  %v3027_v59 = vpop.permute.xlu0 %955 }
 0x30e   : > { %v1017_v48 = vmul.f32 %v984_v25, %v908_v54  ;;  %v735_v54 = vcombine.high %v3024_v57, %v3024_v57  ;;  %v1124_v20 = vmul.f32 %v2643_v8, %v1111_v61  ;;  %v789_v57 = vmul.f32 %v761_v46, %v3003_v23 }
 0x310   : > { %v3062_v62 = vadd.f32 %v1123_v56, %v1017_v48  ;;  %v765_v19 = vrot.slane %v735_v54, %v2881_v34  ;;  %v816_v47 = vmul.f32 1.442695, %v789_v57  ;;  %v2649_v48 = vpop.eup %2648  ;;  %v1021_v56 = vmul.f32 %v992_v49, %v3012_v32 }
 0x311   : > { %v912_v63 = vpop.permute.xlu1 %911  ;;  %v3036_v21 = vpop.permute.xlu0 %1031  ;;  %v996_v32 = vrot.slane %v3084_v33, %v2881_v34 }
 0x312   : > { %v1018_v3 = vmul.f32 %v984_v25, %v912_v63  ;;  %v1138_v27 = vmul.f32 %v2645_v14, %v3062_v62  ;;  %v790_v25 = vmul.f32 %v765_v19, %v2995_v18  ;;  %2654 = vpow2.f32 %v816_v47 }
 0x313   : > { %v791_v54 = vmul.f32 %v765_v19, %v3003_v23  ;;  %v792_v14 = vmul.f32 %v769_v60, %v2995_v18 }
 0x314   : > { %v1126_v28 = vadd.f32 %v1124_v20, %v1018_v3  ;;  %v818_v55 = vmul.f32 1.442695, %v790_v25  ;;  %v793_v25 = vmul.f32 %v769_v60, %v3003_v23  ;;  %v1097_v23 = vmul.f32 %v3031_v1, %v3036_v21 }
 0x315   : > { %v920_v26 = vpop.permute.xlu1 %919  ;;  %v3051_v50 = vpop.permute.xlu0 %1039  ;;  %v820_v11 = vmul.f32 1.442695, %v791_v54 }
 0x316   : > { %v1019_v10 = vmul.f32 %v988_v58, %v920_v26  ;;  %v1139_v46 = vmul.f32 %v2647_v41, %v1126_v28  ;;  %2656 = vpow2.f32 %v818_v55  ;;  %v1023_v41 = vmul.f32 %v996_v32, %v3016_v40 }
 0x317   : > { %2658 = vpow2.f32 %v820_v11  ;;  %v1112_v18 = vmul.f32 %v3047_v31, %v3051_v50  ;;  %v824_v31 = vmul.f32 1.442695, %v793_v25  ;;  %v1099_v54 = vsel %vm597_vm6, %v1097_v23, 0.0 }
 0x318   : > { %v1140_v63 = vadd.f32 %v1138_v27, %v1019_v10 }
 0x319   : > { %v924_v39 = vpop.permute.xlu1 %923  ;;  %v1048_v12 = vpop.permute.xlu0 %1047  ;;  %v1114_v50 = vsel %vm597_vm6, %v1112_v18, 0.0 }
 0x31a   : > { %v1020_v26 = vmul.f32 %v988_v58, %v924_v39  ;;  %v1153_v52 = vmul.f32 %v2649_v48, %v1140_v63  ;;  %v2651_v58 = vpop.eup %2650 }
 0x31b   : > { %v2653_v20 = vpop.eup %2652 }
 0x31c   : > { %v1141_v39 = vadd.f32 %v1139_v46, %v1020_v26  ;;  %v1155_v3 = vadd.f32 %v1153_v52, %v1021_v56  ;;  %v2655_v46 = vpop.eup %2654 }
 0x31d   : > { %v936_v45 = vpop.permute.xlu1 %935  ;;  %v3074_v43 = vpop.permute.xlu0 %967 }
 0x31e   : > { %v1022_v10 = vmul.f32 %v992_v49, %v936_v45  ;;  %v1154_v24 = vmul.f32 %v2651_v58, %v1141_v39  ;;  %v1168_v27 = vmul.f32 %v2653_v20, %v1155_v3  ;;  %v822_v45 = vmul.f32 1.442695, %v792_v14 }
 0x31f   : > { %v874_v49 = vcombine.high %v3069_v29, %v3069_v29 }
 0x320   : > { %v1156_v26 = vadd.f32 %v1154_v24, %v1022_v10  ;;  %v1170_v51 = vadd.f32 %v1168_v27, %v1023_v41  ;;  %2660 = vpow2.f32 %v822_v45 }
 0x321   : > { %v948_v13 = vpop.permute.xlu1 %947  ;;  %v1056_v2 = vpop.permute.xlu0 %1055  ;;  %2662 = vpow2.f32 %v824_v31 }
 0x322   : > { %v1024_v40 = vmul.f32 %v996_v32, %v948_v13  ;;  %v1169_v55 = vmul.f32 %v2655_v46, %v1156_v26  ;;  %v876_v32 = vcombine.high %v3084_v33, %v3084_v33 }
 0x324   : > { %v1171_v10 = vadd.f32 %v1169_v55, %v1024_v40  ;;  %v1004_v33 = vrot.slane %v876_v32, %v2881_v34 }
 0x325   : > { %v3071_v30 = vpop.permute.xlu1 %959  ;;  %v1064_v44 = vpop.permute.xlu0 %1063 }
 0x329   : > { %v1036_v53 = vpop.permute.xlu1 %1035  ;;  %v1072_v60 = vpop.permute.xlu0 %1071 }
 0x32a   : > { %v1098_v48 = vmul.f32 %v3044_v37, %v1036_v53  ;;  %v2657_v37 = vpop.eup %2656  ;;  %v1142_v53 = vmul.f32 %v1140_v63, %v1056_v2  ;;  %v1157_v2 = vmul.f32 %v1155_v3, %v1064_v44  ;;  %v1172_v44 = vmul.f32 %v1170_v51, %v1072_v60 }
 0x32b   : > { %v1183_v21 = vmul.f32 %v2657_v37, %v1170_v51  ;;  %v2659_v20 = vpop.eup %2658 }
 0x32c   : > { %v1100_v29 = vsel %vm597_vm6, %v1098_v48, 0.0  ;;  %v1144_v63 = vsel %vm597_vm6, %v1142_v53, 0.0  ;;  %v1159_v3 = vsel %vm597_vm6, %v1157_v2, 0.0  ;;  %v1027_v53 = vmul.f32 %v1004_v33, %v3074_v43 }
 0x32d   : > { %v1044_v8 = vpop.permute.xlu1 %1043  ;;  %v1101_v14 = vadd.f32 %v1100_v29, %v1099_v54  ;;  %v1080_v18 = vpop.permute.xlu0 %1079  ;;  %v1174_v51 = vsel %vm597_vm6, %v1172_v44, 0.0 }
 0x32e   : > { %v1113_v19 = vmul.f32 %v1111_v61, %v1044_v8  ;;  %v1127_v61 = vmul.f32 %v3062_v62, %v1048_v12  ;;  %v1000_v62 = vrot.slane %v874_v49, %v2881_v34  ;;  %v2661_v49 = vpop.eup %2660 }
 0x32f   : > { %v1102_v45 = vrot.slane %v1101_v14, 4 }
 0x330   : > { %v1129_v12 = vsel %vm597_vm6, %v1127_v61, 0.0  ;;  %v1025_v24 = vmul.f32 %v1000_v62, %v3027_v59  ;;  %v1184_v59 = vmul.f32 %v2659_v20, %v1171_v10 }
 0x331   : > { %v1052_v57 = vpop.permute.xlu1 %1051 }
 0x332   : > { %v1128_v47 = vmul.f32 %v1126_v28, %v1052_v57  ;;  %v1115_v28 = vsel %vm597_vm6, %v1113_v19, 0.0  ;;  %v1185_v57 = vadd.f32 %v1183_v21, %v1025_v24 }
 0x333   : > { %v1116_v1 = vadd.f32 %v1115_v28, %v1114_v50 }
 0x334   : > { %v1130_v56 = vsel %vm597_vm6, %v1128_v47, 0.0  ;;  %v1198_v55 = vmul.f32 %v2661_v49, %v1185_v57  ;;  %v1187_v31 = vmul.f32 %v1185_v57, %v1080_v18 }
 0x335   : > { %v972_v52 = vpop.permute.xlu1 %971  ;;  %v1131_v58 = vadd.f32 %v1130_v56, %v1129_v12  ;;  %v1117_v27 = vrot.slane %v1116_v1, 4  ;;  %v2663_v12 = vpop.eup %2662 }
 0x336   : > { %v1028_v29 = vmul.f32 %v1004_v33, %v972_v52 }
 0x337   : > { %v1132_v41 = vrot.slane %v1131_v58, 4  ;;  %v1118_v61 = vadd.f32 %v1117_v27, %v1116_v1  ;;  %v1088_v1 = vpop.permute.xlu0 %1087 }
 0x339   : > { %v1060_v13 = vpop.permute.xlu1 %1059  ;;  %v1133_v28 = vadd.f32 %v1132_v41, %v1131_v58  ;;  %v1119_v60 = vrot.slane %v1118_v61, 2 }
 0x33a   : > { %v1143_v8 = vmul.f32 %v1141_v39, %v1060_v13  ;;  %v1026_v39 = vmul.f32 %v1000_v62, %v3071_v30 }
 0x33b   : > { %v1134_v58 = vrot.slane %v1133_v28, 2  ;;  %v1120_v27 = vadd.f32 %v1119_v60, %v1118_v61 }
 0x33c   : > { %v1145_v11 = vsel %vm597_vm6, %v1143_v8, 0.0  ;;  %v1186_v56 = vadd.f32 %v1184_v59, %v1026_v39  ;;  %v1200_v8 = vadd.f32 %v1198_v55, %v1027_v53 }
 0x33d   : > { %v1146_v19 = vadd.f32 %v1145_v11, %v1144_v63  ;;  %v1068_v25 = vpop.permute.xlu1 %1067  ;;  %v1189_v63 = vsel %vm597_vm6, %v1187_v31, 0.0  ;;  %v1135_v39 = vadd.f32 %v1134_v58, %v1133_v28 }
 0x33e   : > { %v1158_v47 = vmul.f32 %v1156_v26, %v1068_v25  ;;  %v1103_v26 = vadd.f32 %v1102_v45, %v1101_v14  ;;  %v1199_v24 = vmul.f32 %v2663_v12, %v1186_v56  ;;  %v1202_v11 = vmul.f32 %v1200_v8, %v1088_v1 }
 0x33f   : > { %v1147_v48 = vrot.slane %v1146_v19, 4 }
 0x340   : > { %v1160_v46 = vsel %vm597_vm6, %v1158_v47, 0.0  ;;  %v1104_v14 = vrot.slane %v1103_v26, 2  ;;  %v1201_v32 = vadd.f32 %v1199_v24, %v1028_v29 }
 0x341   : > { %v1161_v23 = vadd.f32 %v1160_v46, %v1159_v3  ;;  %v1076_v40 = vpop.permute.xlu1 %1075  ;;  %v1148_v37 = vadd.f32 %v1147_v48, %v1146_v19  ;;  %v1204_v48 = vsel %vm597_vm6, %v1202_v11, 0.0  ;;  %v1121_v46 = vrot.slane %v1120_v27, 1 }
 0x342   : > { %v1173_v30 = vmul.f32 %v1171_v10, %v1076_v40  ;;  %v1105_v47 = vadd.f32 %v1104_v14, %v1103_v26  ;;  %v1136_v40 = vrot.slane %v1135_v39, 1 }
 0x343   : > { %v1162_v50 = vrot.slane %v1161_v23, 4  ;;  %v1149_v2 = vrot.slane %v1148_v37, 2  ;;  %v1122_v31 = vadd.f32 %v1121_v46, %v1120_v27 }
 0x344   : > { %v1175_v62 = vsel %vm597_vm6, %v1173_v30, 0.0  ;;  %v1106_v61 = vrot.slane %v1105_v47, 1  ;;  %v1137_v53 = vadd.f32 %v1136_v40, %v1135_v39  ;;  %v1344_v39 = vld [vmem:[%s3463_s7] sm:$0xff] }
 0x345   : > { %v1163_v21 = vadd.f32 %v1162_v50, %v1161_v23  ;;  %v1176_v13 = vadd.f32 %v1175_v62, %v1174_v51  ;;  %v1084_v54 = vpop.permute.xlu1 %1083  ;;  %v1150_v59 = vadd.f32 %v1149_v2, %v1148_v37  ;;  %v1465_v40 = vld [vmem:[%s3464_s8] sm:$0xff] }
 0x346   : > { %v1188_v10 = vmul.f32 %v1186_v56, %v1084_v54  ;;  %v1107_v51 = vadd.f32 %v1106_v61, %v1105_v47  ;;  %v1230_v54 = vrot.slane %v2844_v17, %v2943_v22  ;;  %v1466_v61 = vld [vmem:[%s3464_s8 + $0x8] sm:$0xff] }
 0x347   : > { %v1177_v43 = vrot.slane %v1176_v13, 4  ;;  %v1164_v20 = vrot.slane %v1163_v21, 2  ;;  %v1151_v55 = vrot.slane %v1150_v59, 1 }
 0x348   : > { %v1190_v52 = vsel %vm597_vm6, %v1188_v10, 0.0  ;;  %v1214_v1 = vsel %vm1213_vm9, %v1107_v51, %v1122_v31  ;;  %v1469_v31 = vld [vmem:[%s3464_s8 + $0x20] sm:$0xff] }
 0x349   : > { %v1178_v57 = vadd.f32 %v1177_v43, %v1176_v13  ;;  %v1191_v19 = vadd.f32 %v1190_v52, %v1189_v63  ;;  %v1092_v25 = vpop.permute.xlu1 %1091  ;;  %v1165_v3 = vadd.f32 %v1164_v20, %v1163_v21  ;;  %v1152_v29 = vadd.f32 %v1151_v55, %v1150_v59  ;;  %v1245_v52 = vpop.permute.xlu0 %1244  ;;  %v1347_v59 = vld [vmem:[%s3463_s7 + $0x18] sm:$0xff]  ;;  %v1467_v55 = vld [vmem:[%s3464_s8 + $0x10] sm:$0xff] }
 0x34a   : > { %v1203_v41 = vmul.f32 %v1201_v32, %v1092_v25  ;;  %v1216_v58 = vsel %vm1215_vm10, %v1214_v1, %v1137_v53  ;;  %v1231_v43 = vmul.f32 %v1230_v54, %v2920_v5  ;;  %v1472_v53 = vld [vmem:[%s3464_s8 + $0x38] sm:$0xff] }
 0x34b   : > { %v1179_v45 = vrot.slane %v1178_v57, 2  ;;  %v1192_v18 = vrot.slane %v1191_v19, 4  ;;  %v1166_v28 = vrot.slane %v1165_v3, 1  ;;  %v1218_v10 = vsel %vm1217_vm11, %v1216_v58, %v1152_v29 }
 0x34c   : > { %v1205_v44 = vsel %vm597_vm6, %v1203_v41, 0.0  ;;  %v1345_v41 = vld [vmem:[%s3463_s7 + $0x8] sm:$0xff] }
 0x34d   : > { %v1180_v49 = vadd.f32 %v1179_v45, %v1178_v57  ;;  %v1193_v33 = vadd.f32 %v1192_v18, %v1191_v19  ;;  %v1206_v23 = vadd.f32 %v1205_v44, %v1204_v48  ;;  %v1167_v60 = vadd.f32 %v1166_v28, %v1165_v3  ;;  %v3158_v44 = vld [vmem:[%s3462_s6] sm:$0xff] }
 0x34e   : > { %v2570_v47 = vpack.c.bf16 %v1345_v41, %v1344_v39  ;;  %v1342_v46 = vrot.slane %v3158_v44, %v2839_v16  ;;  %v1424_v29 = vrot.slane %v3158_v44, %v2881_v34 }
 0x34f   : > { %v1194_v30 = vrot.slane %v1193_v33, 2  ;;  %v1207_v56 = vrot.slane %v1206_v23, 4  ;;  %v1181_v26 = vrot.slane %v1180_v49, 1  ;;  %v1220_v14 = vsel %vm1219_vm12, %v1218_v10, %v1167_v60 }
 0x350   : > { %2571 = vmatpush3.bf16.msra.mxu1 %v2570_v47  ;;  %v1436_v60 = vrot.slane %v3158_v44, %v2887_v36 }
 0x351   : > { %v1195_v37 = vadd.f32 %v1194_v30, %v1193_v33  ;;  %v1208_v50 = vadd.f32 %v1207_v56, %v1206_v23  ;;  %v1182_v21 = vadd.f32 %v1181_v26, %v1180_v49  ;;  %2572 = vmatprep.subr.bf16.mxu1 %v2720_v6  ;;  %v2576_v30 = vpack.c.bf16 %v1466_v61, %v1465_v40  ;;  %v1468_v56 = vld [vmem:[%s3464_s8 + $0x18] sm:$0xff]  ;;  %v1470_v26 = vld [vmem:[%s3464_s8 + $0x28] sm:$0xff] }
 0x352   : > { %v2579_v28 = vpack.c.bf16 %v1468_v56, %v1467_v55 }
 0x353   : > { %v1196_v62 = vrot.slane %v1195_v37, 1  ;;  %v1209_v12 = vrot.slane %v1208_v50, 2  ;;  %v1222_v63 = vsel %vm1221_vm13, %v1220_v14, %v1182_v21 }
 0x355   : > { %v1210_v13 = vadd.f32 %v1209_v12, %v1208_v50  ;;  %v1197_v8 = vadd.f32 %v1196_v62, %v1195_v37  ;;  %v2582_v37 = vpack.c.bf16 %v1470_v26, %v1469_v31  ;;  %v1471_v50 = vld [vmem:[%s3464_s8 + $0x30] sm:$0xff]  ;;  %v1429_v62 = vrot.slane %v3158_v44, %v2884_v35 }
 0x356   : > { %v2585_v51 = vpack.c.bf16 %v1472_v53, %v1471_v50  ;;  %v2120_v53 = vld [vmem:[%s3466_s10] sm:$0xff] }
 0x357   : > { %v1211_v24 = vrot.slane %v1210_v13, 1  ;;  %v1224_v11 = vsel %vm1223_vm14, %v1222_v63, %v1197_v8  ;;  %v1444_v8 = vrot.slane %v3158_v44, %v2892_v38 }
 0x359   : > { %v1212_v2 = vadd.f32 %v1211_v24, %v1210_v13 }
 0x35b   : > { %v1226_v17 = vsel %vm1225_vm15, %v1224_v11, %v1212_v2  ;;  %v1452_v2 = vrot.slane %v3158_v44, %v2903_v42 }
 0x35c   : > { %v1232_v20 = vadd.f32 %v1231_v43, %v1226_v17 }
 0x35e   : > { %v1247_v32 = vmul.f32 %v1245_v52, %v1232_v20 }
 0x360   : > { %2477 = vmatmul.mubr.msk.f32.vlgmr.msra.gmra.mrb[2].mxu0 %vm597_vm6, %v1247_v32 }
 0x361   : > { %2506 = vmatprep.mubr.msk.f32.mxu0 %vm2721_vm1, %v2722_v9  ;;  %2577 = vmatpush3.bf16.msra.mxu0 %v2576_v30 }
 0x362   : > { %2578 = vmatprep.subr.bf16.mxu0 %v2720_v6 }
 0x365   : > { %2580 = vmatpush3.bf16.msra.mxu0 %v2579_v28 }
 0x366   : > { %2581 = vmatprep.subr.bf16.mxu0 %v2720_v6 }
 0x369   : > { %2583 = vmatpush3.bf16.msra.mxu0 %v2582_v37 }
 0x36a   : > { %2584 = vmatprep.subr.bf16.mxu0 %v2720_v6 }
 0x36d   : > { %2586 = vmatpush3.bf16.msra.mxu0 %v2585_v51  ;;  %v2121_v51 = vld [vmem:[%s3466_s10 + $0x8] sm:$0xff] }
 0x36e   : > { %2599 = vmatprep.subr.bf16.mxu0 %v2720_v6 }
 0x433   : > { %v1325_v27 = vpop.f32.mrb[2].mxu0 }
 0x434   : > { %v3136_v57 = vadd.f32 %v1325_v27, %v2811_v0  ;;  %v2478_v19 = vpop.f32.mrb[3].mxu0  ;;  %v1346_v0 = vld [vmem:[%s3463_s7 + $0x10] sm:$0xff] }
 0x435   : > { %v2573_v45 = vpack.c.bf16 %v1347_v59, %v1346_v0 }
 0x436   : > { %v1331_v5 = vmul.f32 %v3136_v57, %v3136_v57 }
 0x437   : > { %2574 = vmatpush3.bf16.msra.mxu1 %v2573_v45  ;;  %v1476_v45 = vrot.slane %v3158_v44, %v2927_v7 }
 0x438   : > { %v1332_v25 = vsel %vm441_vm0, %v1331_v5, 0.0  ;;  %2587 = vmatprep.subr.bf16.mxu1 %v2720_v6 }
 0x439   : > { %1333 = vadd.xlane.f32.xlu1 %v1332_v25 }
 0x4c6   : > { %v1334_v18 = vpop.xlane.xlu1 %1333 }
 0x4c7   : > { %v1335_v48 = vmul.f32 0.03125, %v1334_v18 }
 0x4c9   : > { %v1336_v3 = vadd.f32 1e-05, %v1335_v48 }
 0x4cb   : > { %2664 = vrsqrt.f32 %v1336_v3 }
 0x4d5   : > { %v2665_v49 = vpop.eup %2664 }
 0x4d6   : > { %v1338_v33 = vmul.f32 %v2665_v49, %v3136_v57 }
 0x4d8   : > { %v1343_v23 = vmul.f32 %v1342_v46, %v1338_v33 }
 0x4da   : > { %2488 = vmatmul.mubr.msk.f32.vlgmr.msra.gmra.mrb[2].mxu1 %vm441_vm0, %v1343_v23 }
 0x4db   : > { %2525 = vmatprep.mubr.msk.f32.mxu1 %vm2721_vm1, %v2722_v9 }
 0x5ad   : > { %v3198_v12 = vpop.f32.mrb[2].mxu1 }
 0x5ae   : > { %v1425_v1 = vmul.f32 %v1424_v29, %v3198_v12  ;;  %v1431_v21 = vrot.slane %v3198_v12, 7  ;;  %v1439_v13 = vrot.slane %v3198_v12, 6  ;;  %v1447_v54 = vrot.slane %v3198_v12, 5  ;;  %v2489_v58 = vpop.f32.mrb[3].mxu1  ;;  %v2122_v29 = vld [vmem:[%s3466_s10 + $0x10] sm:$0xff] }
 0x5af   : > { %v2105_v15 = vand.u32 2147483647, %v3198_v12  ;;  %v2126_v58 = vld [vmem:[%s3466_s10 + $0x30] sm:$0xff] }
 0x5b0   : > { %v1430_v10 = vadd.f32 %v1429_v62, %v1425_v1  ;;  %v1432_v24 = vsel %vm543_vm2, %v1431_v21, 0.0  ;;  %v1440_v14 = vsel %vm554_vm3, %v1439_v13, 0.0  ;;  %v1448_v43 = vsel %vm565_vm4, %v1447_v54, 0.0  ;;  %v2124_v1 = vld [vmem:[%s3466_s10 + $0x20] sm:$0xff]  ;;  %v2125_v21 = vld [vmem:[%s3466_s10 + $0x28] sm:$0xff] }
 0x5b1   : > { %v1437_v63 = vmul.f32 %v1436_v60, %v1432_v24  ;;  %v1445_v17 = vmul.f32 %v1444_v8, %v1440_v14  ;;  %v1453_v52 = vmul.f32 %v1452_v2, %v1448_v43  ;;  %v2106_v18 = vsub.f32 0.0, %v2105_v15  ;;  %v2127_v8 = vld [vmem:[%s3466_s10 + $0x38] sm:$0xff] }
 0x5b2   : > { %v2588_v62 = vpack.c.bf16 %v2121_v51, %v2120_v53  ;;  %v2594_v54 = vpack.c.bf16 %v2125_v21, %v2124_v1  ;;  %v2597_v14 = vpack.c.bf16 %v2127_v8, %v2126_v58 }
 0x5b3   : > { %v1438_v11 = vadd.f32 %v1437_v63, %v1430_v10  ;;  %v2107_v49 = vmul.f32 1.442695, %v2106_v18 }
 0x5b4   : > { %2589 = vmatpush3.bf16.msra.mxu1 %v2588_v62 }
 0x5b5   : > { %v1446_v20 = vadd.f32 %v1445_v17, %v1438_v11  ;;  %2590 = vmatprep.subr.bf16.mxu1 %v2720_v6 }
 0x5b7   : > { %v1454_v32 = vadd.f32 %v1453_v52, %v1446_v20 }
 0x5b9   : > { %v1455_v27 = vand.u32 2147483647, %v1454_v32  ;;  %vm1461_vm2 = vcmp.ge.f32.partialorder %v1454_v32, 0.0 }
 0x5bb   : > { %v1456_v19 = vsub.f32 0.0, %v1455_v27 }
 0x5bd   : > { %v1457_v5 = vmul.f32 1.442695, %v1456_v19 }
 0x5bf   : > { %2666 = vpow2.f32 %v1457_v5 }
 0x5c9   : > { %v2667_v25 = vpop.eup %2666 }
 0x5ca   : > { %v1459_v39 = vadd.f32 1.0, %v2667_v25 }
 0x5cc   : > { %2668 = vrcp.f32 %v1459_v39  ;;  %v3281_v39 = vld [vmem:[%s3465_s9] sm:$0xff] }
 0x5cd   : > { %2670 = vpow2.f32 %v2107_v49 }
 0x5d6   : > { %v2669_v41 = vpop.eup %2668 }
 0x5d7   : > { %v1462_v0 = vmul.f32 %v2669_v41, %v2667_v25  ;;  %v2671_v61 = vpop.eup %2670 }
 0x5d8   : > { %v2109_v55 = vadd.f32 1.0, %v2671_v61 }
 0x5d9   : > { %v1463_v47 = vsel %vm1461_vm2, %v2669_v41, %v1462_v0 }
 0x5da   : > { %v3216_v59 = vmul.f32 %v1463_v47, %v1454_v32  ;;  %2672 = vrcp.f32 %v2109_v55 }
 0x5dc   : > { %2507 = vmatmul.mubr.msk.f32.vlgmr.msra.gmra.mrb[4].mxu0 %vm597_vm6, %v3216_v59 }
 0x5dd   : > { %2536 = vmatprep.mubr.msk.f32.mxu0 %vm2721_vm1, %v2722_v9  ;;  %vm2111_vm1 = vcmp.ge.f32.partialorder %v3198_v12, 0.0 }
 0x6af   : > { %v1546_v48 = vpop.f32.mrb[4].mxu0 }
 0x6b0   : > { %v3225_v3 = vadd.f32 %v1546_v48, %v1476_v45  ;;  %v2508_v46 = vpop.f32.mrb[5].mxu0  ;;  %v3290_v45 = vld [vmem:[%s3465_s9 + $0x8] sm:$0xff] }
 0x6b2   : > { %v1807_v33 = vrot.slane %v3225_v3, %v2839_v16  ;;  %v1759_v23 = vrot.slane %v3225_v3, %v2881_v34  ;;  %v1771_v9 = vrot.slane %v3225_v3, %v2887_v36  ;;  %v1783_v40 = vrot.slane %v3225_v3, %v2892_v38  ;;  %v2673_v38 = vpop.eup %2672 }
 0x6b3   : > { %v1843_v16 = vrot.slane %v3225_v3, %v2927_v7  ;;  %v1795_v30 = vrot.slane %v3225_v3, %v2903_v42  ;;  %v1819_v36 = vrot.slane %v3225_v3, %v2884_v35  ;;  %v1831_v7 = vrot.slane %v3225_v3, %v2943_v22 }
 0x6b4   : > { %1814 = vbcast.lane.b32.xlu1 %v1807_v33, 328  ;;  %1762 = vbcast.lane.b32.xlu0 %v1759_v23, 320  ;;  %v2112_v56 = vmul.f32 %v2673_v38, %v2671_v61  ;;  %v1550_v35 = vand.u32 2147483647, %v3225_v3  ;;  %v1563_v17 = vmax.f32 %v3225_v3, 0.0 }
 0x6b6   : > { %v2113_v42 = vsel %vm2111_vm1, %v2673_v38, %v2112_v56  ;;  %v1551_v31 = vsub.f32 0.0, %v1550_v35 }
 0x6b7   : > { %v2114_v28 = vmul.f32 %v2113_v42, %v3198_v12  ;;  %v2123_v12 = vld [vmem:[%s3466_s10 + $0x18] sm:$0xff] }
 0x6b8   : > { %1910 = vbcast.lane.b32.xlu1 %v1759_v23, 336  ;;  %1766 = vbcast.lane.b32.xlu0 %v1759_v23, 328  ;;  %v1552_v26 = vmul.f32 1.442695, %v1551_v31  ;;  %v2591_v60 = vpack.c.bf16 %v2123_v12, %v2122_v29 }
 0x6ba   : > { %2674 = vpow2.f32 %v1552_v26  ;;  %2592 = vmatpush3.bf16.msra.mxu1 %v2591_v60 }
 0x6bb   : > { %2593 = vmatprep.subr.bf16.mxu1 %v2720_v6 }
 0x6bc   : > { %1918 = vbcast.lane.b32.xlu1 %v1771_v9, 336  ;;  %1774 = vbcast.lane.b32.xlu0 %v1771_v9, 320 }
 0x6be   : > { %2595 = vmatpush3.bf16.msra.mxu1 %v2594_v54 }
 0x6bf   : > { %2596 = vmatprep.subr.bf16.mxu1 %v2720_v6 }
 0x6c0   : > { %1926 = vbcast.lane.b32.xlu1 %v1783_v40, 336  ;;  %1778 = vbcast.lane.b32.xlu0 %v1771_v9, 328 }
 0x6c2   : > { %2598 = vmatpush3.bf16.msra.mxu1 %v2597_v14 }
 0x6c4   : > { %1846 = vbcast.lane.b32.xlu1 %v1843_v16, 320  ;;  %1786 = vbcast.lane.b32.xlu0 %v1783_v40, 320  ;;  %v2675_v37 = vpop.eup %2674 }
 0x6c5   : > { %v1554_v50 = vadd.f32 1.0, %v2675_v37  ;;  %v1557_v13 = vmul.f32 -0.5, %v2675_v37  ;;  %v1560_v63 = vand.u32 2147483647, %v2675_v37 }
 0x6c7   : > { %2676 = vlog2.f32 %v1554_v50  ;;  %v1558_v24 = vadd.f32 1.0, %v1557_v13  ;;  %vm1561_vm3 = vcmp.lt.f32.partialorder %v1560_v63, 0.0004427343 }
 0x6c8   : > { %1934 = vbcast.lane.b32.xlu1 %v1795_v30, 336  ;;  %1790 = vbcast.lane.b32.xlu0 %v1783_v40, 328 }
 0x6c9   : > { %v1559_v43 = vmul.f32 %v2675_v37, %v1558_v24 }
 0x6cc   : > { %1942 = vbcast.lane.b32.xlu1 %v1807_v33, 336  ;;  %1798 = vbcast.lane.b32.xlu0 %v1795_v30, 320 }
 0x6d0   : > { %1950 = vbcast.lane.b32.xlu1 %v1819_v36, 336  ;;  %1802 = vbcast.lane.b32.xlu0 %v1795_v30, 328 }
 0x6d1   : > { %v2677_v10 = vpop.eup %2676 }
 0x6d2   : > { %v1556_v2 = vmul.f32 0.6931472, %v2677_v10 }
 0x6d4   : > { %1958 = vbcast.lane.b32.xlu1 %v1831_v7, 336  ;;  %1810 = vbcast.lane.b32.xlu0 %v1807_v33, 320  ;;  %v1562_v11 = vsel %vm1561_vm3, %v1559_v43, %v1556_v2 }
 0x6d5   : > { %v1564_v20 = vadd.f32 %v1563_v17, %v1562_v11 }
 0x6d7   : > { %v1575_v52 = vrot.slane %v1564_v20, %v2986_v4  ;;  %v3294_v3 = vmul.f32 %v1564_v20, %v3216_v59  ;;  %v1568_v61 = vcombine.high %v1564_v20, %v1564_v20 }
 0x6d8   : > { %1966 = vbcast.lane.b32.xlu1 %v1843_v16, 336  ;;  %1822 = vbcast.lane.b32.xlu0 %v1819_v36, 320 }
 0x6d9   : > { %v1591_v27 = vrot.slane %v1575_v52, %v2986_v4  ;;  %v1583_v5 = vcombine.high %v1575_v52, %v1575_v52  ;;  %v1582_v56 = vrot.slane %v1568_v61, %v2986_v4 }
 0x6db   : > { %v1620_v25 = vrot.slane %v1591_v27, %v2881_v34  ;;  %v1605_v0 = vrot.slane %v1583_v5, %v2986_v4  ;;  %v1613_v46 = vcombine.high %v1591_v27, %v1591_v27  ;;  %v1598_v50 = vrot.slane %v1582_v56, %v2986_v4 }
 0x6dc   : > { %2116 = vrot.lane.b32.xlu1 %v2114_v28, %s2723_s29  ;;  %1826 = vbcast.lane.b32.xlu0 %v1819_v36, 328  ;;  %v1584_v21 = vcombine.high %v1582_v56, %v1582_v56 }
 0x6dd   : > { %v1657_v47 = vmul.f32 %v1620_v25, %v3281_v39  ;;  %v1624_v48 = vrot.slane %v1605_v0, %v2881_v34  ;;  %v1636_v58 = vrot.slane %v1598_v50, %v2881_v34 }
 0x6de   : > { %v1612_v63 = vrot.slane %v1584_v21, %v2986_v4 }
 0x6df   : > { %v1673_v18 = vmul.f32 1.442695, %v1657_v47  ;;  %v1660_v28 = vmul.f32 %v1624_v48, %v3290_v45 }
 0x6e0   : > { %1834 = vbcast.lane.b32.xlu0 %v1831_v7, 320  ;;  %v1640_v47 = vrot.slane %v1612_v63, %v2881_v34 }
 0x6e1   : > { %2678 = vpow2.f32 %v1673_v18  ;;  %v1679_v62 = vmul.f32 1.442695, %v1660_v28  ;;  %v1666_v28 = vmul.f32 %v1636_v58, %v3290_v45 }
 0x6e4   : > { %1838 = vbcast.lane.b32.xlu0 %v1831_v7, 328 }
 0x6e8   : > { %1914 = vbcast.lane.b32.xlu0 %v1759_v23, 344  ;;  %v1659_v23 = vmul.f32 %v1624_v48, %v3281_v39  ;;  %v1707_v48 = vcombine.high %v3294_v3, %v3294_v3 }
 0x6ea   : > { %v1721_v56 = vrot.slane %v1707_v48, %v2986_v4 }
 0x6eb   : > { %v2679_v53 = vpop.eup %2678 }
 0x6ec   : > { %1922 = vbcast.lane.b32.xlu0 %v1771_v9, 344  ;;  %v1714_v9 = vrot.slane %v3294_v3, %v2986_v4  ;;  %v1972_v54 = vmul.f32 0.0, %v2679_v53  ;;  %v1667_v3 = vmul.f32 %v1640_v47, %v3281_v39 }
 0x6ee   : > { %v1730_v38 = vrot.slane %v1714_v9, %v2986_v4  ;;  %v1722_v35 = vcombine.high %v1714_v9, %v1714_v9 }
 0x6f0   : > { %1930 = vbcast.lane.b32.xlu0 %v1783_v40, 344  ;;  %v1628_v40 = vrot.slane %v1613_v46, %v2881_v34  ;;  %v1855_v26 = vrot.slane %v1730_v38, %v2881_v34  ;;  %v1744_v60 = vrot.slane %v1722_v35, %v2986_v4  ;;  %v1752_v52 = vcombine.high %v1730_v38, %v1730_v38 }
 0x6f1   : > { %v1614_v38 = vcombine.high %v1598_v50, %v1598_v50 }
 0x6f2   : > { %v1662_v13 = vmul.f32 %v1628_v40, %v3290_v45  ;;  %v1859_v24 = vrot.slane %v1744_v60, %v2881_v34  ;;  %v1754_v9 = vcombine.high %v1744_v60, %v1744_v60  ;;  %v1691_v60 = vmul.f32 1.442695, %v1666_v28 }
 0x6f3   : > { %v1644_v53 = vrot.slane %v1614_v38, %v2881_v34 }
 0x6f4   : > { %1850 = vbcast.lane.b32.xlu0 %v1843_v16, 328  ;;  %v1683_v11 = vmul.f32 1.442695, %v1662_v13 }
 0x6f8   : > { %1938 = vbcast.lane.b32.xlu0 %v1795_v30, 344  ;;  %v1615_v30 = vcombine.high %v1605_v0, %v1605_v0 }
 0x6fa   : > { %v1632_v31 = vrot.slane %v1615_v30, %v2881_v34 }
 0x6fc   : > { %1946 = vbcast.lane.b32.xlu0 %v1807_v33, 344  ;;  %v1658_v33 = vmul.f32 %v1620_v25, %v3290_v45  ;;  %v1663_v1 = vmul.f32 %v1632_v31, %v3281_v39  ;;  %v1664_v25 = vmul.f32 %v1632_v31, %v3290_v45 }
 0x6fe   : > { %v1675_v55 = vmul.f32 1.442695, %v1658_v33  ;;  %v1685_v14 = vmul.f32 1.442695, %v1663_v1  ;;  %v1687_v61 = vmul.f32 1.442695, %v1664_v25 }
 0x700   : > { %1954 = vbcast.lane.b32.xlu0 %v1819_v36, 344  ;;  %v1677_v36 = vmul.f32 1.442695, %v1659_v23  ;;  %2680 = vpow2.f32 %v1675_v55 }
 0x702   : > { %2682 = vpow2.f32 %v1677_v36 }
 0x704   : > { %1962 = vbcast.lane.b32.xlu0 %v1831_v7, 344  ;;  %v1661_v7 = vmul.f32 %v1628_v40, %v3281_v39 }
 0x706   : > { %v1681_v37 = vmul.f32 1.442695, %v1661_v7 }
 0x708   : > { %1970 = vbcast.lane.b32.xlu0 %v1843_v16, 344  ;;  %2684 = vpow2.f32 %v1681_v37 }
 0x709   : > { %2686 = vpow2.f32 %v1679_v62  ;;  %v3359_v62 = vrot.slane %v1721_v56, %v2986_v4 }
 0x70a   : > { %v2681_v2 = vpop.eup %2680  ;;  %2688 = vpow2.f32 %v1685_v14 }
 0x70b   : > { %v1973_v18 = vmul.f32 0.0, %v2681_v2  ;;  %2690 = vpow2.f32 %v1683_v11  ;;  %v1669_v2 = vmul.f32 %v1644_v53, %v3281_v39 }
 0x70c   : > { %v2683_v27 = vpop.eup %2682 }
 0x70d   : > { %v1697_v48 = vmul.f32 1.442695, %v1669_v2 }
 0x712   : > { %v2685_v55 = vpop.eup %2684 }
 0x713   : > { %v2687_v7 = vpop.eup %2686 }
 0x714   : > { %v2689_v1 = vpop.eup %2688 }
 0x726   : > { %v1763_v32 = vpop.permute.xlu0 %1762  ;;  %v3314_v51 = vpop.permute.xlu1 %1814 }
 0x727   : > { %v1892_v12 = vmul.f32 %v1855_v26, %v1763_v32  ;;  %v1665_v32 = vmul.f32 %v1636_v58, %v3281_v39  ;;  %v2691_v58 = vpop.eup %2690 }
 0x729   : > { %v3324_v10 = vadd.f32 %v1972_v54, %v1892_v12  ;;  %v1689_v46 = vmul.f32 1.442695, %v1665_v32  ;;  %v1616_v54 = vcombine.high %v1612_v63, %v1612_v63 }
 0x72a   : > { %v1767_v19 = vpop.permute.xlu0 %1766  ;;  %v3328_v43 = vpop.permute.xlu1 %1910 }
 0x72b   : > { %v1893_v17 = vmul.f32 %v1855_v26, %v1767_v19  ;;  %v1987_v0 = vmul.f32 %v2683_v27, %v3324_v10  ;;  %2692 = vpow2.f32 %v1689_v46  ;;  %v1867_v26 = vrot.slane %v1754_v9, %v2881_v34 }
 0x72c   : > { %2694 = vpow2.f32 %v1687_v61 }
 0x72d   : > { %v3341_v33 = vadd.f32 %v1973_v18, %v1893_v17  ;;  %v1871_v17 = vrot.slane %v3359_v62, %v2881_v34 }
 0x72e   : > { %v1775_v41 = vpop.permute.xlu0 %1774  ;;  %v3343_v23 = vpop.permute.xlu1 %1918 }
 0x72f   : > { %v1894_v20 = vmul.f32 %v1859_v24, %v1775_v41  ;;  %v1863_v41 = vrot.slane %v1752_v52, %v2881_v34  ;;  %v1988_v31 = vmul.f32 %v2687_v7, %v3341_v33  ;;  %v1723_v52 = vcombine.high %v1721_v56, %v1721_v56 }
 0x731   : > { %v3338_v19 = vadd.f32 %v1987_v0, %v1894_v20  ;;  %v1668_v20 = vmul.f32 %v1640_v47, %v3290_v45  ;;  %v3375_v9 = vrot.slane %v1723_v52, %v2986_v4  ;;  %v1753_v4 = vcombine.high %v3359_v62, %v3359_v62 }
 0x732   : > { %v3285_v15 = vpop.permute.xlu0 %1778  ;;  %v1927_v12 = vpop.permute.xlu1 %1926  ;;  %v1976_v62 = vmul.f32 %v3324_v10, %v3328_v43 }
 0x733   : > { %v1895_v30 = vmul.f32 %v1859_v24, %v3285_v15  ;;  %v2002_v35 = vmul.f32 %v2685_v55, %v3338_v19  ;;  %v1695_v46 = vmul.f32 1.442695, %v1668_v20  ;;  %v1879_v2 = vrot.slane %v1753_v4, %v2881_v34 }
 0x735   : > { %v1990_v50 = vadd.f32 %v1988_v31, %v1895_v30  ;;  %v2693_v25 = vpop.eup %2692 }
 0x736   : > { %v3296_v49 = vpop.permute.xlu0 %1786  ;;  %v3370_v63 = vpop.permute.xlu1 %1846 }
 0x737   : > { %v1896_v36 = vmul.f32 %v1863_v41, %v3296_v49  ;;  %v1693_v49 = vmul.f32 1.442695, %v1667_v3  ;;  %v2003_v11 = vmul.f32 %v2691_v58, %v1990_v50 }
 0x739   : > { %v2004_v15 = vadd.f32 %v2002_v35, %v1896_v36  ;;  %2696 = vpow2.f32 %v1693_v49  ;;  %v1670_v36 = vmul.f32 %v1644_v53, %v3290_v45 }
 0x73a   : > { %v3303_v16 = vpop.permute.xlu0 %1790  ;;  %2698 = vpow2.f32 %v1691_v60  ;;  %v1935_v7 = vpop.permute.xlu1 %1934  ;;  %v1991_v60 = vmul.f32 %v3338_v19, %v3343_v23 }
 0x73b   : > { %v1897_v21 = vmul.f32 %v1863_v41, %v3303_v16  ;;  %v2017_v14 = vmul.f32 %v2689_v1, %v2004_v15  ;;  %v1648_v16 = vrot.slane %v1616_v54, %v2881_v34  ;;  %v2695_v41 = vpop.eup %2694  ;;  %2700 = vpow2.f32 %v1697_v48 }
 0x73c   : > { %2702 = vpow2.f32 %v1695_v46  ;;  %v2006_v58 = vmul.f32 %v2004_v15, %v1927_v12  ;;  %v1978_v12 = vsel %vm597_vm6, %v1976_v62, 0.0 }
 0x73d   : > { %v1671_v61 = vmul.f32 %v1648_v16, %v3281_v39  ;;  %v1699_v39 = vmul.f32 1.442695, %v1670_v36 }
 0x73e   : > { %v3308_v42 = vpop.permute.xlu0 %1798 }
 0x73f   : > { %v1898_v13 = vmul.f32 %v1867_v26, %v3308_v42  ;;  %v2005_v42 = vadd.f32 %v2003_v11, %v1897_v21  ;;  %v1701_v56 = vmul.f32 1.442695, %v1671_v61  ;;  %v1672_v21 = vmul.f32 %v1648_v16, %v3290_v45 }
 0x740   : > { %v1993_v45 = vsel %vm597_vm6, %v1991_v60, 0.0  ;;  %v2008_v16 = vsel %vm597_vm6, %v2006_v58, 0.0 }
 0x741   : > { %v2019_v32 = vadd.f32 %v2017_v14, %v1898_v13  ;;  %v2018_v55 = vmul.f32 %v2695_v41, %v2005_v42  ;;  %v1901_v13 = vmul.f32 %v1871_v17, %v3314_v51  ;;  %2704 = vpow2.f32 %v1701_v56  ;;  %v1943_v14 = vpop.permute.xlu1 %1942 }
 0x742   : > { %v3316_v29 = vpop.permute.xlu0 %1802  ;;  %2706 = vpow2.f32 %v1699_v39  ;;  %v1703_v11 = vmul.f32 1.442695, %v1672_v21 }
 0x743   : > { %v1899_v0 = vmul.f32 %v1867_v26, %v3316_v29  ;;  %v2032_v47 = vmul.f32 %v2693_v25, %v2019_v32  ;;  %v2697_v29 = vpop.eup %2696 }
 0x744   : > { %v2699_v28 = vpop.eup %2698  ;;  %2708 = vpow2.f32 %v1703_v11 }
 0x745   : > { %v2020_v38 = vadd.f32 %v2018_v55, %v1899_v0  ;;  %v1951_v48 = vpop.permute.xlu1 %1950 }
 0x746   : > { %v3322_v8 = vpop.permute.xlu0 %1810 }
 0x747   : > { %v1900_v18 = vmul.f32 %v1871_v17, %v3322_v8  ;;  %v1875_v8 = vrot.slane %v3375_v9, %v2881_v34  ;;  %v2033_v53 = vmul.f32 %v2699_v28, %v2020_v38  ;;  %v2701_v17 = vpop.eup %2700 }
 0x748   : > { %v2703_v15 = vpop.eup %2702 }
 0x749   : > { %v2034_v3 = vadd.f32 %v2032_v47, %v1900_v18  ;;  %v2035_v23 = vadd.f32 %v2033_v53, %v1901_v13 }
 0x74a   : > { %v3331_v5 = vpop.permute.xlu0 %1822 }
 0x74b   : > { %v1902_v31 = vmul.f32 %v1875_v8, %v3331_v5  ;;  %v2047_v26 = vmul.f32 %v2697_v29, %v2034_v3  ;;  %v2048_v18 = vmul.f32 %v2703_v15, %v2035_v23 }
 0x74e   : > { %v3345_v40 = vpop.permute.xlu0 %1826 }
 0x74f   : > { %v1903_v20 = vmul.f32 %v1875_v8, %v3345_v40  ;;  %v2036_v40 = vmul.f32 %v2034_v3, %v1943_v14 }
 0x751   : > { %v2050_v61 = vadd.f32 %v2048_v18, %v1903_v20  ;;  %v2038_v4 = vsel %vm597_vm6, %v2036_v40, 0.0 }
 0x752   : > { %v3355_v37 = vpop.permute.xlu0 %1834 }
 0x753   : > { %v1904_v10 = vmul.f32 %v1879_v2, %v3355_v37 }
 0x756   : > { %v3363_v24 = vpop.permute.xlu0 %1838 }
 0x75a   : > { %v1915_v27 = vpop.permute.xlu0 %1914 }
 0x75b   : > { %v1977_v54 = vmul.f32 %v3341_v33, %v1915_v27  ;;  %v2021_v33 = vmul.f32 %v2019_v32, %v1935_v7  ;;  %v1755_v32 = vcombine.high %v3375_v9, %v3375_v9  ;;  %v2705_v7 = vpop.eup %2704 }
 0x75c   : > { %v2707_v56 = vpop.eup %2706 }
 0x75d   : > { %v1979_v43 = vsel %vm597_vm6, %v1977_v54, 0.0  ;;  %v2023_v46 = vsel %vm597_vm6, %v2021_v33, 0.0  ;;  %v1883_v9 = vrot.slane %v1755_v32, %v2881_v34 }
 0x75e   : > { %v1923_v30 = vpop.permute.xlu0 %1922  ;;  %v1980_v41 = vadd.f32 %v1979_v43, %v1978_v12 }
 0x75f   : > { %v1992_v49 = vmul.f32 %v1990_v50, %v1923_v30  ;;  %v2049_v50 = vadd.f32 %v2047_v26, %v1902_v31  ;;  %v2063_v26 = vmul.f32 %v2707_v56, %v2050_v61 }
 0x760   : > { %v1981_v3 = vrot.slane %v1980_v41, 4 }
 0x761   : > { %v1994_v19 = vsel %vm597_vm6, %v1992_v49, 0.0  ;;  %v2062_v27 = vmul.f32 %v2701_v17, %v2049_v50  ;;  %v1959_v49 = vpop.permute.xlu1 %1958 }
 0x762   : > { %v1931_v35 = vpop.permute.xlu0 %1930  ;;  %v1995_v52 = vadd.f32 %v1994_v19, %v1993_v45  ;;  %v1982_v58 = vadd.f32 %v1981_v3, %v1980_v41 }
 0x763   : > { %v2007_v1 = vmul.f32 %v2005_v42, %v1931_v35  ;;  %v2064_v37 = vadd.f32 %v2062_v27, %v1904_v10  ;;  %v2051_v35 = vmul.f32 %v2049_v50, %v1951_v48 }
 0x764   : > { %v1996_v55 = vrot.slane %v1995_v52, 4  ;;  %v1983_v12 = vrot.slane %v1982_v58, 2 }
 0x765   : > { %v2009_v51 = vsel %vm597_vm6, %v2007_v1, 0.0  ;;  %v2077_v39 = vmul.f32 %v2705_v7, %v2064_v37  ;;  %v2066_v62 = vmul.f32 %v2064_v37, %v1959_v49  ;;  %v2053_v50 = vsel %vm597_vm6, %v2051_v35, 0.0  ;;  %v1967_v15 = vpop.permute.xlu1 %1966 }
 0x766   : > { %v1851_v5 = vpop.permute.xlu0 %1850  ;;  %v2010_v25 = vadd.f32 %v2009_v51, %v2008_v16  ;;  %v1997_v53 = vadd.f32 %v1996_v55, %v1995_v52  ;;  %v2709_v51 = vpop.eup %2708 }
 0x768   : > { %v2011_v29 = vrot.slane %v2010_v25, 4  ;;  %v1998_v11 = vrot.slane %v1997_v53, 2 }
 0x76a   : > { %v1939_v42 = vpop.permute.xlu0 %1938  ;;  %v2012_v21 = vadd.f32 %v2011_v29, %v2010_v25  ;;  %v1999_v18 = vadd.f32 %v1998_v11, %v1997_v53 }
 0x76b   : > { %v2022_v0 = vmul.f32 %v2020_v38, %v1939_v42  ;;  %v1905_v38 = vmul.f32 %v1879_v2, %v3363_v24  ;;  %v1906_v24 = vmul.f32 %v1883_v9, %v3370_v63  ;;  %v2068_v42 = vsel %vm597_vm6, %v2066_v62, 0.0 }
 0x76c   : > { %v2013_v10 = vrot.slane %v2012_v21, 2 }
 0x76d   : > { %v2024_v47 = vsel %vm597_vm6, %v2022_v0, 0.0  ;;  %v2065_v54 = vadd.f32 %v2063_v26, %v1905_v38  ;;  %v2079_v19 = vadd.f32 %v2077_v39, %v1906_v24  ;;  %v2000_v38 = vrot.slane %v1999_v18, 1 }
 0x76e   : > { %v2025_v30 = vadd.f32 %v2024_v47, %v2023_v46  ;;  %v1947_v36 = vpop.permute.xlu0 %1946  ;;  %v2014_v41 = vadd.f32 %v2013_v10, %v2012_v21  ;;  %v1984_v46 = vadd.f32 %v1983_v12, %v1982_v58 }
 0x76f   : > { %v2037_v8 = vmul.f32 %v2035_v23, %v1947_v36  ;;  %v1907_v23 = vmul.f32 %v1883_v9, %v1851_v5  ;;  %v2078_v43 = vmul.f32 %v2709_v51, %v2065_v54  ;;  %v2081_v0 = vmul.f32 %v2079_v19, %v1967_v15 }
 0x770   : > { %v2026_v28 = vrot.slane %v2025_v30, 4  ;;  %v2015_v9 = vrot.slane %v2014_v41, 1  ;;  %v1985_v3 = vrot.slane %v1984_v46, 1 }
 0x771   : > { %v2039_v31 = vsel %vm597_vm6, %v2037_v8, 0.0  ;;  %v2080_v25 = vadd.f32 %v2078_v43, %v1907_v23  ;;  %v2083_v36 = vsel %vm597_vm6, %v2081_v0, 0.0  ;;  %v2102_v23 = vrot.slane %v3158_v44, %v2943_v22  ;;  %v2117_v43 = vpop.permute.xlu1 %2116 }
 0x772   : > { %v2040_v60 = vadd.f32 %v2039_v31, %v2038_v4  ;;  %v1955_v1 = vpop.permute.xlu0 %1954  ;;  %v2027_v14 = vadd.f32 %v2026_v28, %v2025_v30  ;;  %v2001_v31 = vadd.f32 %v2000_v38, %v1999_v18 }
 0x773   : > { %v2052_v13 = vmul.f32 %v2050_v61, %v1955_v1  ;;  %v1986_v1 = vadd.f32 %v1985_v3, %v1984_v46 }
 0x774   : > { %v2041_v2 = vrot.slane %v2040_v60, 4  ;;  %v2028_v52 = vrot.slane %v2027_v14, 2 }
 0x775   : > { %v2054_v45 = vsel %vm597_vm6, %v2052_v13, 0.0  ;;  %v2092_v62 = vsel %vm1213_vm9, %v1986_v1, %v2001_v31 }
 0x776   : > { %v2042_v17 = vadd.f32 %v2041_v2, %v2040_v60  ;;  %v2055_v33 = vadd.f32 %v2054_v45, %v2053_v50  ;;  %v1963_v20 = vpop.permute.xlu0 %1962  ;;  %v2029_v47 = vadd.f32 %v2028_v52, %v2027_v14  ;;  %v2016_v60 = vadd.f32 %v2015_v9, %v2014_v41 }
 0x777   : > { %v2067_v63 = vmul.f32 %v2065_v54, %v1963_v20  ;;  %v2103_v20 = vmul.f32 %v2102_v23, %v3216_v59  ;;  %v2226_v59 = vld [vmem:[%s3468_s12 + $0x8] sm:$0xff] }
 0x778   : > { %v2056_v16 = vrot.slane %v2055_v33, 4  ;;  %v2043_v27 = vrot.slane %v2042_v17, 2  ;;  %v2030_v28 = vrot.slane %v2029_v47, 1  ;;  %v2093_v2 = vsel %vm1215_vm10, %v2092_v62, %v2016_v60 }
 0x779   : > { %v2069_v5 = vsel %vm597_vm6, %v2067_v63, 0.0 }
 0x77a   : > { %v2057_v32 = vadd.f32 %v2056_v16, %v2055_v33  ;;  %v2070_v48 = vadd.f32 %v2069_v5, %v2068_v42  ;;  %v1971_v40 = vpop.permute.xlu0 %1970  ;;  %v2044_v30 = vadd.f32 %v2043_v27, %v2042_v17  ;;  %v2031_v24 = vadd.f32 %v2030_v28, %v2029_v47  ;;  %v2225_v42 = vld [vmem:[%s3468_s12] sm:$0xff]  ;;  %v2227_v27 = vld [vmem:[%s3468_s12 + $0x10] sm:$0xff] }
 0x77b   : > { %v2082_v37 = vmul.f32 %v2080_v25, %v1971_v40  ;;  %v2600_v5 = vpack.c.bf16 %v2226_v59, %v2225_v42 }
 0x77c   : > { %v2058_v61 = vrot.slane %v2057_v32, 2  ;;  %v2071_v55 = vrot.slane %v2070_v48, 4  ;;  %v2045_v39 = vrot.slane %v2044_v30, 1  ;;  %v2094_v50 = vsel %vm1217_vm11, %v2093_v2, %v2031_v24 }
 0x77d   : > { %v2084_v7 = vsel %vm597_vm6, %v2082_v37, 0.0  ;;  %2601 = vmatpush3.bf16.msra.mxu0 %v2600_v5 }
 0x77e   : > { %v2059_v29 = vadd.f32 %v2058_v61, %v2057_v32  ;;  %v2072_v8 = vadd.f32 %v2071_v55, %v2070_v48  ;;  %v2085_v56 = vadd.f32 %v2084_v7, %v2083_v36  ;;  %v2046_v54 = vadd.f32 %v2045_v39, %v2044_v30  ;;  %2602 = vmatprep.subr.bf16.mxu0 %v2720_v6  ;;  %v2202_v48 = vld [vmem:[%s3467_s11] sm:$0x3] }
 0x77f   : > { %v2214_v40 = vrot.slane %v2202_v48, %v2881_v34 }
 0x780   : > { %v2073_v4 = vrot.slane %v2072_v8, 2  ;;  %v2086_v35 = vrot.slane %v2085_v56, 4  ;;  %v2060_v26 = vrot.slane %v2059_v29, 1  ;;  %v2095_v51 = vsel %vm1219_vm12, %v2094_v50, %v2046_v54 }
 0x782   : > { %v2074_v49 = vadd.f32 %v2073_v4, %v2072_v8  ;;  %v2087_v53 = vadd.f32 %v2086_v35, %v2085_v56  ;;  %v2061_v58 = vadd.f32 %v2060_v26, %v2059_v29  ;;  %v2230_v29 = vrot.slane %v2202_v48, 1 }
 0x784   : > { %v2075_v21 = vrot.slane %v2074_v49, 1  ;;  %v2088_v13 = vrot.slane %v2087_v53, 2  ;;  %v2096_v11 = vsel %vm1221_vm13, %v2095_v51, %v2061_v58 }
 0x786   : > { %v2089_v14 = vadd.f32 %v2088_v13, %v2087_v53  ;;  %v2076_v19 = vadd.f32 %v2075_v21, %v2074_v49 }
 0x788   : > { %v2090_v45 = vrot.slane %v2089_v14, 1  ;;  %v2097_v33 = vsel %vm1223_vm14, %v2096_v11, %v2076_v19 }
 0x78a   : > { %v2091_v17 = vadd.f32 %v2090_v45, %v2089_v14 }
 0x78c   : > { %v2098_v10 = vsel %vm1225_vm15, %v2097_v33, %v2091_v17 }
 0x78d   : > { %v2104_v63 = vadd.f32 %v2103_v20, %v2098_v10 }
 0x78f   : > { %v2119_v15 = vmul.f32 %v2117_v43, %v2104_v63 }
 0x791   : > { %2526 = vmatmul.mubr.msk.f32.vlgmr.msra.gmra.mrb[4].mxu1 %vm597_vm6, %v2119_v15 }
 0x864   : > { %v2197_v22 = vpop.f32.mrb[4].mxu1 }
 0x865   : > { %v2201_v44 = vadd.f32 %v2197_v22, %v3136_v57  ;;  %v2527_v12 = vpop.f32.mrb[5].mxu1  ;;  %v2228_v57 = vld [vmem:[%s3468_s12 + $0x18] sm:$0xff] }
 0x866   : > { %v2603_v25 = vpack.c.bf16 %v2228_v57, %v2227_v27 }
 0x867   : > { %v2203_v52 = vmul.f32 %v2201_v44, %v2201_v44 }
 0x868   : > { %2604 = vmatpush3.bf16.msra.mxu0 %v2603_v25 }
 0x869   : > { %v2204_v16 = vsel %vm441_vm0, %v2203_v52, 0.0 }
 0x86a   : > { %2205 = vadd.xlane.f32.xlu0 %v2204_v16 }
 0x8f7   : > { %v2206_v0 = vpop.xlane.xlu0 %2205 }
 0x8f8   : > { %v2207_v18 = vmul.f32 0.03125, %v2206_v0 }
 0x8fa   : > { %v2208_v32 = vadd.f32 1e-05, %v2207_v18 }
 0x8fc   : > { %2710 = vrsqrt.f32 %v2208_v32 }
 0x906   : > { %v2711_v41 = vpop.eup %2710 }
 0x907   : > { %v2210_v37 = vmul.f32 %v2711_v41, %v2201_v44 }
 0x909   : > { %v2215_v46 = vmul.f32 %v2214_v40, %v2210_v37 }
 0x90b   : > { %v2216_v47 = vsel %vm441_vm0, %v2215_v46, 0.0 }
 0x90c   : > { %v2217_v61 = vrot.slane %v2216_v47, 4 }
 0x90e   : > { %v2218_v55 = vadd.f32 %v2217_v61, %v2216_v47 }
 0x910   : > { %v2219_v6 = vrot.slane %v2218_v55, 2 }
 0x912   : > { %v2220_v30 = vadd.f32 %v2219_v6, %v2218_v55 }
 0x914   : > { %v2221_v36 = vrot.slane %v2220_v30, 1 }
 0x916   : > { %v2222_v7 = vadd.f32 %v2221_v36, %v2220_v30 }
 0x918   : > { %v2224_v38 = vmul.f32 0.125, %v2222_v7 }
 0x91a   : > { %2537 = vmatmul.mubr.msk.f32.vlgmr.msra.gmra.mrb[6].mxu0 %vm441_vm0, %v2224_v38 }
 0x9ed   : > { %v2301_v8 = vpop.f32.mrb[6].mxu0 }
 0x9ee   : > { %v2302_v56 = vadd.f32 %v2301_v8, %v2230_v29  ;;  %v2538_v9 = vpop.f32.mrb[7].mxu0 }
 0x9f0   : > { %v2308_v3 = vrot.slane %v2302_v56, %v2881_v34 }
 0x9f2   : > { %2309 = vst [vmem:[%s435_s23] sm:$0xff] %v2308_v3 }
 0x9f3 PF: > { %s23_s25 = sadd.s32 1, %s2718_s25  }
 0x9f4   : > { %p20_p4 = scmp.ge.s32.totalorder %s23_s25, 4  }
 0x9f6   :  { %22 = sbr.rel (!%p20_p4) target bundleno = 1 (0x1), region = 102 }

</bundles_post_ra>
